<compile_context>
chip_gen: v6e
topology: v6e:2x2x1
jax: 0.10.0
libtpu: 0.0.40
codegen_flags: <defaults>
</compile_context>

<pallas_src>
import functools

import jax
import jax.numpy as jnp
from jax import lax
from jax.experimental import pallas as pl
from jax.experimental.pallas import tpu as pltpu


_SQRT1_2 = 0.7071067811865476


def _round_up(x, m):
    return ((x + m - 1) // m) * m


# ------------------------- in-kernel helpers -------------------------------

def _batchnorm(x, gamma, beta, eps):
    # BatchNorm1d in training mode: biased batch variance, affine transform.
    mu = jnp.mean(x, axis=0, keepdims=True)
    var = jnp.mean((x - mu) * (x - mu), axis=0, keepdims=True)
    return (x - mu) * lax.rsqrt(var + eps) * gamma + beta


def _gelu(x, approx):
    if approx:
        # tanh-approx GELU runs on the otherwise-idle EUP slot (opt-in).
        return jax.nn.gelu(x, approximate=True)
    # Exact erf-GELU, matching torch.nn.GELU(approximate='none').
    return 0.5 * x * (1.0 + lax.erf(x * _SQRT1_2))


def _softplus(x):
    # Matches F.softplus(beta=1, threshold=20): x if x > 20 else log1p(exp(x)).
    return jnp.where(x > 20.0, x, jnp.log1p(jnp.exp(jnp.minimum(x, 20.0))))


# ------------------------------ kernel --------------------------------------

def _encoder_kernel(meta, eps, approx_gelu, *refs):
    n = meta["n"]
    z_dim = meta["z_dim"]
    widths20 = meta["widths20"]
    p_h = meta["p_h"]
    p_out = meta["p_out"]
    cd = meta["compute_dtype"]

    x_refs = refs[0:n]
    w1_refs = refs[n:2 * n]
    w2_refs = refs[2 * n:3 * n]
    wc_ref, wfc2_ref, wmv_ref, pvec_ref, out_ref = refs[3 * n:]

    # Packed 1-row params: load once, slice statically (broadcasts hoisted so
    # each broadcast_in_dim is emitted exactly once).
    pv = pvec_ref[...]
    b1 = [pv[i:i + 1, :widths20[i]] for i in range(n)]
    b2 = pv[n + 0:n + 1, :p_h]
    bc = pv[n + 1:n + 2, :p_h]
    g1 = pv[n + 2:n + 3, :p_h]
    be1 = pv[n + 3:n + 4, :p_h]
    bfc2 = pv[n + 4:n + 5, :p_h]
    g2 = pv[n + 5:n + 6, :p_h]
    be2 = pv[n + 6:n + 7, :p_h]
    bmv = pv[n + 7:n + 8, :p_out]

    def mm(a, w_ref):
        # MXU matmul; operands in compute dtype, accumulation always f32.
        return jnp.dot(a.astype(cd), w_ref[...], preferred_element_type=jnp.float32)

    # Per-branch Linear -> Linear.  Branch i's second matmul has its d_i output
    # columns placed at that branch's offset inside a 128-lane-padded slab (all
    # other columns are exact zeros), so summing the branch results equals
    # torch.cat(x, dim=1) padded to p_h lanes -- no in-kernel concat needed.
    h2 = None
    for i in range(n):
        hi = mm(x_refs[i][...], w1_refs[i]) + b1[i]
        hi2 = mm(hi, w2_refs[i])
        h2 = hi2 if h2 is None else h2 + hi2
    h2 = h2 + b2

    h = mm(h2, wc_ref) + bc                       # concat Linear (lane-padded)
    h = _gelu(_batchnorm(h, g1, be1, eps), approx_gelu)
    h = mm(h, wfc2_ref) + bfc2                    # fc2
    h = _gelu(_batchnorm(h, g2, be2, eps), approx_gelu)

    mv = mm(h, wmv_ref) + bmv                     # fused [z_mean | z_log_var] head
    lane = lax.broadcasted_iota(jnp.int32, mv.shape, 1)
    is_logvar = (lane >= z_dim) & (lane < 2 * z_dim)   # pad lanes stay untouched
    out_ref[...] = jnp.where(is_logvar, _softplus(mv), mv)
    # TODO(synk): sampling path (self.sample=True) would need pltpu.prng_* noise;
    # the module default is sample=False so it is not exercised here.


# --------------------------- host-side packing -------------------------------

def pack_params(p, z_dim, use_bf16_matmul=True):
    """One-time packing of Encoder params.

    Call once at init / after a parameter update and reuse the result across
    forwards; do NOT call per forward (packing itself costs more than the
    kernel at small shapes).
    """
    n = len(p["w1"])
    dims = [w.shape[1] for w in p["w2"]]
    widths20 = [w.shape[1] for w in p["w1"]]
    sum_d = sum(dims)
    p_h = _round_up(max(sum_d, z_dim), 128)     # lane-dense hidden width
    p_out = _round_up(2 * z_dim, 128)           # lane-dense head/output width
    w_dtype = jnp.bfloat16 if use_bf16_matmul else jnp.float32

    w1 = tuple(w.astype(w_dtype) for w in p["w1"])

    # W2 per branch: [20*d_i, p_h] with its d_i columns at the branch offset.
    w2 = []
    off = 0
    for i in range(n):
        w = jnp.zeros((widths20[i], p_h), jnp.float32)
        w = w.at[:, off:off + dims[i]].set(p["w2"][i])
        w2.append(w.astype(w_dtype))
        off += dims[i]
    w2 = tuple(w2)

    wc = (jnp.zeros((p_h, p_h), jnp.float32)
          .at[:sum_d, :z_dim].set(p["wc"]).astype(w_dtype))
    wfc2 = (jnp.zeros((p_h, p_h), jnp.float32)
            .at[:z_dim, :z_dim].set(p["wfc2"]).astype(w_dtype))
    wmv = (jnp.zeros((p_h, p_out), jnp.float32)
           .at[:z_dim, :z_dim].set(p["wm"])
           .at[:z_dim, z_dim:2 * z_dim].set(p["wv"]).astype(w_dtype))

    max_w = max(p_h, p_out, max(widths20))

    def row(vals):
        r = jnp.zeros((max_w,), jnp.float32)
        return r.at[:vals.reshape(-1).shape[0]].set(vals.reshape(-1))

    b2 = jnp.zeros((p_h,), jnp.float32)
    off = 0
    for i in range(n):
        b2 = b2.at[off:off + dims[i]].set(p["b2"][i].reshape(-1))
        off += dims[i]

    rows = [row(p["b1"][i]) for i in range(n)]
    rows += [row(b2), row(p["bc"]),
             row(p["g1"]), row(p["be1"]),
             row(p["bfc2"]), row(p["g2"]), row(p["be2"]),
             row(jnp.concatenate([p["bm"].reshape(-1), p["bv"].reshape(-1)]))]
    pvec = jnp.stack(rows, axis=0)               # [n+8, max_w]

    meta = dict(n=n, z_dim=z_dim, dims=tuple(dims), widths20=tuple(widths20),
                p_h=p_h, p_out=p_out,
                compute_dtype=(jnp.bfloat16 if use_bf16_matmul else jnp.float32))
    return dict(w1=w1, w2=w2, wc=wc, wfc2=wfc2, wmv=wmv, pvec=pvec, meta=meta)


# ------------------------------ wrapper --------------------------------------

def _resident_vmem_bytes(xs, packed, batch):
    meta = packed["meta"]
    nbytes = sum(int(x.size) * x.dtype.itemsize for x in xs)
    for w in (*packed["w1"], *packed["w2"], packed["wc"], packed["wfc2"],
              packed["wmv"], packed["pvec"]):
        nbytes += int(w.size) * w.dtype.itemsize
    nbytes += batch * meta["p_out"] * 4                 # output slab
    nbytes += 6 * batch * meta["p_h"] * 4               # f32 intermediates
    nbytes += 4 * batch * max(meta["widths20"])         # per-branch hidden
    return nbytes


def encoder_forward(xs, packed, eps=1e-3, approx_gelu=False):
    """Fused Encoder forward; xs is the list of n [batch, shape_i] arrays."""
    meta = packed["meta"]
    n, z_dim = meta["n"], meta["z_dim"]
    assert len(xs) == n
    batch = xs[0].shape[0]

    # Gridless design keeps the full batch resident in VMEM because
    # BatchNorm1d (train mode) needs full-batch statistics.  Guard against the
    # smallest scoped-VMEM default (v5e: 16 MiB scoped; v7x: 64 MiB physical).
    if _resident_vmem_bytes(xs, packed, batch) > 12 * 1024 * 1024:
        raise ValueError(
            "Encoder batch too large for full-VMEM residency. Add a batch grid "
            "(>=256-row tiles, Buffered(2)) with a two-pass BatchNorm "
            "(per-tile sum/sumsq accumulation in VMEM scratch), or raise "
            "pltpu.CompilerParams(vmem_limit_bytes=...) for mid-size batches.")

    kernel = functools.partial(_encoder_kernel, meta, eps, approx_gelu)
    args = (*xs, *packed["w1"], *packed["w2"],
            packed["wc"], packed["wfc2"], packed["wmv"], packed["pvec"])

    out = pl.pallas_call(
        kernel,
        out_shape=jax.ShapeDtypeStruct((batch, meta["p_out"]), jnp.float32),
        in_specs=[pl.BlockSpec(memory_space=pltpu.MemorySpace.VMEM)
                  for _ in args],
        out_specs=pl.BlockSpec(memory_space=pltpu.MemorySpace.VMEM),
    )(*args)

    return out[:, :z_dim], out[:, z_dim:2 * z_dim]


# --------------------------- parameter init ----------------------------------

def init_params(key, z_dim, n, shape, weight):
    dims = [max(int(z_dim * weight[i]), 1) for i in range(n)]
    keys = iter(jax.random.split(key, 4 * n + 16))

    def linear_init(fan_in, fan_out):
        # PyTorch nn.Linear default init: U(-1/sqrt(fan_in), 1/sqrt(fan_in)).
        bound = 1.0 / (fan_in ** 0.5)
        w = jax.random.uniform(next(keys), (fan_in, fan_out), jnp.float32, -bound, bound)
        b = jax.random.uniform(next(keys), (1, fan_out), jnp.float32, -bound, bound)
        return w, b

    p = {"w1": [], "b1": [], "w2": [], "b2": []}
    for i in range(n):
        w1, b1 = linear_init(shape[i], 20 * dims[i])
        w2, b2 = linear_init(20 * dims[i], dims[i])
        p["w1"].append(w1); p["b1"].append(b1)
        p["w2"].append(w2); p["b2"].append(b2)

    sum_d = sum(dims) if n > 1 else dims[0]
    p["wc"], p["bc"] = linear_init(sum_d, z_dim)
    p["g1"] = jnp.ones((1, z_dim), jnp.float32)
    p["be1"] = jnp.zeros((1, z_dim), jnp.float32)
    p["wfc2"], p["bfc2"] = linear_init(z_dim, z_dim)
    p["g2"] = jnp.ones((1, z_dim), jnp.float32)
    p["be2"] = jnp.zeros((1, z_dim), jnp.float32)
    p["wm"], p["bm"] = linear_init(z_dim, z_dim)
    p["wv"], p["bv"] = linear_init(z_dim, z_dim)
    return p, dims


# ------------------------- pure-JAX reference ---------------------------------

def encoder_reference(xs, p, eps=1e-3):
    lin = lambda a, w, b: jnp.dot(a, w, precision="highest") + b

    hs = [lin(xs[i], p["w1"][i], p["b1"][i]) for i in range(len(xs))]
    hs = [lin(hs[i], p["w2"][i], p["b2"][i]) for i in range(len(xs))]
    h = jnp.concatenate(hs, axis=1) if len(xs) > 1 else hs[0]
    h = lin(h, p["wc"], p["bc"])

    def bn(x, g, b):
        mu = jnp.mean(x, axis=0, keepdims=True)
        var = jnp.mean((x - mu) ** 2, axis=0, keepdims=True)
        return (x - mu) / jnp.sqrt(var + eps) * g + b

    gelu = lambda x: 0.5 * x * (1.0 + lax.erf(x * _SQRT1_2))
    h = gelu(bn(h, p["g1"], p["be1"]))
    h = gelu(bn(lin(h, p["wfc2"], p["bfc2"]), p["g2"], p["be2"]))
    z_mean = lin(h, p["wm"], p["bm"])
    pre = lin(h, p["wv"], p["bv"])
    z_log_var = jnp.where(pre > 20.0, pre, jnp.log1p(jnp.exp(jnp.minimum(pre, 20.0))))
    return z_mean, z_log_var


# --------------------------------- main ---------------------------------------

if __name__ == "__main__":
    # Small shapes consistent with the module's forward (x is a list of n
    # per-modality feature matrices of shape [batch, shape[i]]).
    z_dim = 32
    n = 4
    shape = [32, 48, 40, 16]
    weight = [0.25, 0.25, 0.25, 0.25]
    batch = 8

    key = jax.random.PRNGKey(0)
    kx, kp = jax.random.split(key)
    xkeys = jax.random.split(kx, n)
    xs = [jax.random.normal(xkeys[i], (batch, shape[i]), jnp.float32) for i in range(n)]

    params, _ = init_params(kp, z_dim, n, shape, weight)
    zm_ref, zv_ref = encoder_reference(xs, params)

    # f32-operand mode: numerically faithful to the f32 PyTorch module.
    packed_f32 = pack_params(params, z_dim, use_bf16_matmul=False)
    zm32, zv32 = encoder_forward(xs, packed_f32)
    jax.block_until_ready((zm32, zv32))
    assert zm32.shape == (batch, z_dim) and zv32.shape == (batch, z_dim)
    assert bool(jnp.allclose(zm32, zm_ref, rtol=5e-3, atol=5e-3))
    assert bool(jnp.allclose(zv32, zv_ref, rtol=5e-3, atol=5e-3))

    # Default fast path: bf16 MXU operands (f32 accumulate, f32 elementwise).
    packed = pack_params(params, z_dim)       # pack ONCE, reuse across forwards
    z_mean, z_log_var = encoder_forward(xs, packed)
    jax.block_until_ready((z_mean, z_log_var))
    assert z_mean.shape == (batch, z_dim) and z_log_var.shape == (batch, z_dim)
    assert bool(jnp.all(jnp.isfinite(z_mean))) and bool(jnp.all(z_log_var >= 0.0))
    assert bool(jnp.allclose(z_mean, zm_ref, rtol=5e-2, atol=5e-2))
    assert bool(jnp.allclose(z_log_var, zv_ref, rtol=5e-2, atol=5e-2))

    print("KERNEL_OK")
</pallas_src>

<mosaic_0001>
module attributes {stable_mosaic.version = 11 : i64} {
  func.func @_encoder_kernel(%arg0: memref<8x32xf32, #tpu.memory_space<vmem>>, %arg1: memref<8x48xf32, #tpu.memory_space<vmem>>, %arg2: memref<8x40xf32, #tpu.memory_space<vmem>>, %arg3: memref<8x16xf32, #tpu.memory_space<vmem>>, %arg4: memref<32x160xf32, #tpu.memory_space<vmem>>, %arg5: memref<48x160xf32, #tpu.memory_space<vmem>>, %arg6: memref<40x160xf32, #tpu.memory_space<vmem>>, %arg7: memref<16x160xf32, #tpu.memory_space<vmem>>, %arg8: memref<160x128xf32, #tpu.memory_space<vmem>>, %arg9: memref<160x128xf32, #tpu.memory_space<vmem>>, %arg10: memref<160x128xf32, #tpu.memory_space<vmem>>, %arg11: memref<160x128xf32, #tpu.memory_space<vmem>>, %arg12: memref<128x128xf32, #tpu.memory_space<vmem>>, %arg13: memref<128x128xf32, #tpu.memory_space<vmem>>, %arg14: memref<128x128xf32, #tpu.memory_space<vmem>>, %arg15: memref<12x160xf32, #tpu.memory_space<vmem>>, %arg16: memref<8x128xf32, #tpu.memory_space<vmem>>) attributes {dimension_semantics = [], scalar_prefetch = 0 : i64, scratch_operands = 0 : i64, tpu.core_type = #tpu.core_type<tc>} {
    %c0 = arith.constant 0 : index
    %c0_0 = arith.constant 0 : index
    %0 = vector.load %arg15[%c0, %c0_0] : memref<12x160xf32, #tpu.memory_space<vmem>>, vector<12x160xf32>
    %1 = vector.extract_strided_slice %0 {offsets = [0, 0], sizes = [1, 160], strides = [1, 1]} : vector<12x160xf32> to vector<1x160xf32>
    %2 = vector.extract_strided_slice %0 {offsets = [1, 0], sizes = [1, 160], strides = [1, 1]} : vector<12x160xf32> to vector<1x160xf32>
    %3 = vector.extract_strided_slice %0 {offsets = [2, 0], sizes = [1, 160], strides = [1, 1]} : vector<12x160xf32> to vector<1x160xf32>
    %4 = vector.extract_strided_slice %0 {offsets = [3, 0], sizes = [1, 160], strides = [1, 1]} : vector<12x160xf32> to vector<1x160xf32>
    %5 = vector.extract_strided_slice %0 {offsets = [4, 0], sizes = [1, 128], strides = [1, 1]} : vector<12x160xf32> to vector<1x128xf32>
    %6 = vector.extract_strided_slice %0 {offsets = [5, 0], sizes = [1, 128], strides = [1, 1]} : vector<12x160xf32> to vector<1x128xf32>
    %7 = vector.extract_strided_slice %0 {offsets = [6, 0], sizes = [1, 128], strides = [1, 1]} : vector<12x160xf32> to vector<1x128xf32>
    %8 = vector.extract_strided_slice %0 {offsets = [7, 0], sizes = [1, 128], strides = [1, 1]} : vector<12x160xf32> to vector<1x128xf32>
    %9 = vector.extract_strided_slice %0 {offsets = [8, 0], sizes = [1, 128], strides = [1, 1]} : vector<12x160xf32> to vector<1x128xf32>
    %10 = vector.extract_strided_slice %0 {offsets = [9, 0], sizes = [1, 128], strides = [1, 1]} : vector<12x160xf32> to vector<1x128xf32>
    %11 = vector.extract_strided_slice %0 {offsets = [10, 0], sizes = [1, 128], strides = [1, 1]} : vector<12x160xf32> to vector<1x128xf32>
    %12 = vector.extract_strided_slice %0 {offsets = [11, 0], sizes = [1, 128], strides = [1, 1]} : vector<12x160xf32> to vector<1x128xf32>
    %c0_1 = arith.constant 0 : index
    %c0_2 = arith.constant 0 : index
    %13 = vector.load %arg0[%c0_1, %c0_2] : memref<8x32xf32, #tpu.memory_space<vmem>>, vector<8x32xf32>
    %c0_3 = arith.constant 0 : index
    %c0_4 = arith.constant 0 : index
    %14 = vector.load %arg4[%c0_3, %c0_4] : memref<32x160xf32, #tpu.memory_space<vmem>>, vector<32x160xf32>
    %cst = arith.constant dense<0.000000e+00> : vector<8x160xf32>
    %15 = tpu.matmul %13, %14, %cst {dimension_numbers = #tpu.dot_dimension_numbers<[1], [0], [0], [1], [0, 0, 1, 1], [], []>} : vector<8x32xf32>, vector<32x160xf32>, vector<8x160xf32> -> vector<8x160xf32>
    %16 = vector.broadcast %1 : vector<1x160xf32> to vector<8x160xf32>
    %17 = arith.addf %15, %16 : vector<8x160xf32>
    %c0_5 = arith.constant 0 : index
    %c0_6 = arith.constant 0 : index
    %18 = vector.load %arg8[%c0_5, %c0_6] : memref<160x128xf32, #tpu.memory_space<vmem>>, vector<160x128xf32>
    %cst_7 = arith.constant dense<0.000000e+00> : vector<8x128xf32>
    %19 = tpu.matmul %17, %18, %cst_7 {dimension_numbers = #tpu.dot_dimension_numbers<[1], [0], [0], [1], [0, 0, 1, 1], [], []>} : vector<8x160xf32>, vector<160x128xf32>, vector<8x128xf32> -> vector<8x128xf32>
    %c0_8 = arith.constant 0 : index
    %c0_9 = arith.constant 0 : index
    %20 = vector.load %arg1[%c0_8, %c0_9] : memref<8x48xf32, #tpu.memory_space<vmem>>, vector<8x48xf32>
    %c0_10 = arith.constant 0 : index
    %c0_11 = arith.constant 0 : index
    %21 = vector.load %arg5[%c0_10, %c0_11] : memref<48x160xf32, #tpu.memory_space<vmem>>, vector<48x160xf32>
    %cst_12 = arith.constant dense<0.000000e+00> : vector<8x160xf32>
    %22 = tpu.matmul %20, %21, %cst_12 {dimension_numbers = #tpu.dot_dimension_numbers<[1], [0], [0], [1], [0, 0, 1, 1], [], []>} : vector<8x48xf32>, vector<48x160xf32>, vector<8x160xf32> -> vector<8x160xf32>
    %23 = vector.broadcast %2 : vector<1x160xf32> to vector<8x160xf32>
    %24 = arith.addf %22, %23 : vector<8x160xf32>
    %c0_13 = arith.constant 0 : index
    %c0_14 = arith.constant 0 : index
    %25 = vector.load %arg9[%c0_13, %c0_14] : memref<160x128xf32, #tpu.memory_space<vmem>>, vector<160x128xf32>
    %cst_15 = arith.constant dense<0.000000e+00> : vector<8x128xf32>
    %26 = tpu.matmul %24, %25, %cst_15 {dimension_numbers = #tpu.dot_dimension_numbers<[1], [0], [0], [1], [0, 0, 1, 1], [], []>} : vector<8x160xf32>, vector<160x128xf32>, vector<8x128xf32> -> vector<8x128xf32>
    %27 = arith.addf %19, %26 : vector<8x128xf32>
    %c0_16 = arith.constant 0 : index
    %c0_17 = arith.constant 0 : index
    %28 = vector.load %arg2[%c0_16, %c0_17] : memref<8x40xf32, #tpu.memory_space<vmem>>, vector<8x40xf32>
    %c0_18 = arith.constant 0 : index
    %c0_19 = arith.constant 0 : index
    %29 = vector.load %arg6[%c0_18, %c0_19] : memref<40x160xf32, #tpu.memory_space<vmem>>, vector<40x160xf32>
    %cst_20 = arith.constant dense<0.000000e+00> : vector<8x160xf32>
    %30 = tpu.matmul %28, %29, %cst_20 {dimension_numbers = #tpu.dot_dimension_numbers<[1], [0], [0], [1], [0, 0, 1, 1], [], []>} : vector<8x40xf32>, vector<40x160xf32>, vector<8x160xf32> -> vector<8x160xf32>
    %31 = vector.broadcast %3 : vector<1x160xf32> to vector<8x160xf32>
    %32 = arith.addf %30, %31 : vector<8x160xf32>
    %c0_21 = arith.constant 0 : index
    %c0_22 = arith.constant 0 : index
    %33 = vector.load %arg10[%c0_21, %c0_22] : memref<160x128xf32, #tpu.memory_space<vmem>>, vector<160x128xf32>
    %cst_23 = arith.constant dense<0.000000e+00> : vector<8x128xf32>
    %34 = tpu.matmul %32, %33, %cst_23 {dimension_numbers = #tpu.dot_dimension_numbers<[1], [0], [0], [1], [0, 0, 1, 1], [], []>} : vector<8x160xf32>, vector<160x128xf32>, vector<8x128xf32> -> vector<8x128xf32>
    %35 = arith.addf %27, %34 : vector<8x128xf32>
    %c0_24 = arith.constant 0 : index
    %c0_25 = arith.constant 0 : index
    %36 = vector.load %arg3[%c0_24, %c0_25] : memref<8x16xf32, #tpu.memory_space<vmem>>, vector<8x16xf32>
    %c0_26 = arith.constant 0 : index
    %c0_27 = arith.constant 0 : index
    %37 = vector.load %arg7[%c0_26, %c0_27] : memref<16x160xf32, #tpu.memory_space<vmem>>, vector<16x160xf32>
    %cst_28 = arith.constant dense<0.000000e+00> : vector<8x160xf32>
    %38 = tpu.matmul %36, %37, %cst_28 {dimension_numbers = #tpu.dot_dimension_numbers<[1], [0], [0], [1], [0, 0, 1, 1], [], []>} : vector<8x16xf32>, vector<16x160xf32>, vector<8x160xf32> -> vector<8x160xf32>
    %39 = vector.broadcast %4 : vector<1x160xf32> to vector<8x160xf32>
    %40 = arith.addf %38, %39 : vector<8x160xf32>
    %c0_29 = arith.constant 0 : index
    %c0_30 = arith.constant 0 : index
    %41 = vector.load %arg11[%c0_29, %c0_30] : memref<160x128xf32, #tpu.memory_space<vmem>>, vector<160x128xf32>
    %cst_31 = arith.constant dense<0.000000e+00> : vector<8x128xf32>
    %42 = tpu.matmul %40, %41, %cst_31 {dimension_numbers = #tpu.dot_dimension_numbers<[1], [0], [0], [1], [0, 0, 1, 1], [], []>} : vector<8x160xf32>, vector<160x128xf32>, vector<8x128xf32> -> vector<8x128xf32>
    %43 = arith.addf %35, %42 : vector<8x128xf32>
    %44 = vector.broadcast %5 : vector<1x128xf32> to vector<8x128xf32>
    %45 = arith.addf %43, %44 : vector<8x128xf32>
    %c0_32 = arith.constant 0 : index
    %c0_33 = arith.constant 0 : index
    %46 = vector.load %arg12[%c0_32, %c0_33] : memref<128x128xf32, #tpu.memory_space<vmem>>, vector<128x128xf32>
    %cst_34 = arith.constant dense<0.000000e+00> : vector<8x128xf32>
    %47 = tpu.matmul %45, %46, %cst_34 {dimension_numbers = #tpu.dot_dimension_numbers<[1], [0], [0], [1], [0, 0, 1, 1], [], []>} : vector<8x128xf32>, vector<128x128xf32>, vector<8x128xf32> -> vector<8x128xf32>
    %48 = vector.broadcast %6 : vector<1x128xf32> to vector<8x128xf32>
    %49 = arith.addf %47, %48 : vector<8x128xf32>
    %cst_35 = arith.constant dense<0.000000e+00> : vector<128xf32>
    %50 = vector.multi_reduction <add>, %49, %cst_35 [0] : vector<8x128xf32> to vector<128xf32>
    %51 = vector.shape_cast %50 : vector<128xf32> to vector<1x128xf32>
    %cst_36 = arith.constant 8.000000e+00 : f32
    %52 = vector.broadcast %cst_36 : f32 to vector<1x128xf32>
    %53 = arith.divf %51, %52 : vector<1x128xf32>
    %54 = vector.broadcast %53 : vector<1x128xf32> to vector<8x128xf32>
    %55 = arith.subf %49, %54 : vector<8x128xf32>
    %56 = vector.broadcast %53 : vector<1x128xf32> to vector<8x128xf32>
    %57 = arith.subf %49, %56 : vector<8x128xf32>
    %58 = arith.mulf %55, %57 : vector<8x128xf32>
    %cst_37 = arith.constant dense<0.000000e+00> : vector<128xf32>
    %59 = vector.multi_reduction <add>, %58, %cst_37 [0] : vector<8x128xf32> to vector<128xf32>
    %60 = vector.shape_cast %59 : vector<128xf32> to vector<1x128xf32>
    %cst_38 = arith.constant 8.000000e+00 : f32
    %61 = vector.broadcast %cst_38 : f32 to vector<1x128xf32>
    %62 = arith.divf %60, %61 : vector<1x128xf32>
    %63 = vector.broadcast %53 : vector<1x128xf32> to vector<8x128xf32>
    %64 = arith.subf %49, %63 : vector<8x128xf32>
    %cst_39 = arith.constant 1.000000e-03 : f32
    %65 = vector.broadcast %cst_39 : f32 to vector<1x128xf32>
    %66 = arith.addf %62, %65 : vector<1x128xf32>
    %67 = math.rsqrt %66 : vector<1x128xf32>
    %68 = vector.broadcast %67 : vector<1x128xf32> to vector<8x128xf32>
    %69 = arith.mulf %64, %68 : vector<8x128xf32>
    %70 = vector.broadcast %7 : vector<1x128xf32> to vector<8x128xf32>
    %71 = arith.mulf %69, %70 : vector<8x128xf32>
    %72 = vector.broadcast %8 : vector<1x128xf32> to vector<8x128xf32>
    %73 = arith.addf %71, %72 : vector<8x128xf32>
    %cst_40 = arith.constant 5.000000e-01 : f32
    %74 = vector.broadcast %cst_40 : f32 to vector<8x128xf32>
    %75 = arith.mulf %74, %73 : vector<8x128xf32>
    %cst_41 = arith.constant 0.707106769 : f32
    %76 = vector.broadcast %cst_41 : f32 to vector<8x128xf32>
    %77 = arith.mulf %73, %76 : vector<8x128xf32>
    %78 = math.erf %77 : vector<8x128xf32>
    %cst_42 = arith.constant 1.000000e+00 : f32
    %79 = vector.broadcast %cst_42 : f32 to vector<8x128xf32>
    %80 = arith.addf %79, %78 : vector<8x128xf32>
    %81 = arith.mulf %75, %80 : vector<8x128xf32>
    %c0_43 = arith.constant 0 : index
    %c0_44 = arith.constant 0 : index
    %82 = vector.load %arg13[%c0_43, %c0_44] : memref<128x128xf32, #tpu.memory_space<vmem>>, vector<128x128xf32>
    %cst_45 = arith.constant dense<0.000000e+00> : vector<8x128xf32>
    %83 = tpu.matmul %81, %82, %cst_45 {dimension_numbers = #tpu.dot_dimension_numbers<[1], [0], [0], [1], [0, 0, 1, 1], [], []>} : vector<8x128xf32>, vector<128x128xf32>, vector<8x128xf32> -> vector<8x128xf32>
    %84 = vector.broadcast %9 : vector<1x128xf32> to vector<8x128xf32>
    %85 = arith.addf %83, %84 : vector<8x128xf32>
    %cst_46 = arith.constant dense<0.000000e+00> : vector<128xf32>
    %86 = vector.multi_reduction <add>, %85, %cst_46 [0] : vector<8x128xf32> to vector<128xf32>
    %87 = vector.shape_cast %86 : vector<128xf32> to vector<1x128xf32>
    %cst_47 = arith.constant 8.000000e+00 : f32
    %88 = vector.broadcast %cst_47 : f32 to vector<1x128xf32>
    %89 = arith.divf %87, %88 : vector<1x128xf32>
    %90 = vector.broadcast %89 : vector<1x128xf32> to vector<8x128xf32>
    %91 = arith.subf %85, %90 : vector<8x128xf32>
    %92 = vector.broadcast %89 : vector<1x128xf32> to vector<8x128xf32>
    %93 = arith.subf %85, %92 : vector<8x128xf32>
    %94 = arith.mulf %91, %93 : vector<8x128xf32>
    %cst_48 = arith.constant dense<0.000000e+00> : vector<128xf32>
    %95 = vector.multi_reduction <add>, %94, %cst_48 [0] : vector<8x128xf32> to vector<128xf32>
    %96 = vector.shape_cast %95 : vector<128xf32> to vector<1x128xf32>
    %cst_49 = arith.constant 8.000000e+00 : f32
    %97 = vector.broadcast %cst_49 : f32 to vector<1x128xf32>
    %98 = arith.divf %96, %97 : vector<1x128xf32>
    %99 = vector.broadcast %89 : vector<1x128xf32> to vector<8x128xf32>
    %100 = arith.subf %85, %99 : vector<8x128xf32>
    %cst_50 = arith.constant 1.000000e-03 : f32
    %101 = vector.broadcast %cst_50 : f32 to vector<1x128xf32>
    %102 = arith.addf %98, %101 : vector<1x128xf32>
    %103 = math.rsqrt %102 : vector<1x128xf32>
    %104 = vector.broadcast %103 : vector<1x128xf32> to vector<8x128xf32>
    %105 = arith.mulf %100, %104 : vector<8x128xf32>
    %106 = vector.broadcast %10 : vector<1x128xf32> to vector<8x128xf32>
    %107 = arith.mulf %105, %106 : vector<8x128xf32>
    %108 = vector.broadcast %11 : vector<1x128xf32> to vector<8x128xf32>
    %109 = arith.addf %107, %108 : vector<8x128xf32>
    %cst_51 = arith.constant 5.000000e-01 : f32
    %110 = vector.broadcast %cst_51 : f32 to vector<8x128xf32>
    %111 = arith.mulf %110, %109 : vector<8x128xf32>
    %cst_52 = arith.constant 0.707106769 : f32
    %112 = vector.broadcast %cst_52 : f32 to vector<8x128xf32>
    %113 = arith.mulf %109, %112 : vector<8x128xf32>
    %114 = math.erf %113 : vector<8x128xf32>
    %cst_53 = arith.constant 1.000000e+00 : f32
    %115 = vector.broadcast %cst_53 : f32 to vector<8x128xf32>
    %116 = arith.addf %115, %114 : vector<8x128xf32>
    %117 = arith.mulf %111, %116 : vector<8x128xf32>
    %c0_54 = arith.constant 0 : index
    %c0_55 = arith.constant 0 : index
    %118 = vector.load %arg14[%c0_54, %c0_55] : memref<128x128xf32, #tpu.memory_space<vmem>>, vector<128x128xf32>
    %cst_56 = arith.constant dense<0.000000e+00> : vector<8x128xf32>
    %119 = tpu.matmul %117, %118, %cst_56 {dimension_numbers = #tpu.dot_dimension_numbers<[1], [0], [0], [1], [0, 0, 1, 1], [], []>} : vector<8x128xf32>, vector<128x128xf32>, vector<8x128xf32> -> vector<8x128xf32>
    %120 = vector.broadcast %12 : vector<1x128xf32> to vector<8x128xf32>
    %121 = arith.addf %119, %120 : vector<8x128xf32>
    %122 = tpu.iota {dimensions = array<i32: 1>} : vector<8x128xi32>
    %c32_i32 = arith.constant 32 : i32
    %123 = vector.broadcast %c32_i32 : i32 to vector<8x128xi32>
    %124 = arith.cmpi sge, %122, %123 : vector<8x128xi32>
    %c64_i32 = arith.constant 64 : i32
    %125 = vector.broadcast %c64_i32 : i32 to vector<8x128xi32>
    %126 = arith.cmpi slt, %122, %125 : vector<8x128xi32>
    %127 = arith.andi %124, %126 : vector<8x128xi1>
    %cst_57 = arith.constant 2.000000e+01 : f32
    %128 = vector.broadcast %cst_57 : f32 to vector<8x128xf32>
    %129 = arith.cmpf ogt, %121, %128 : vector<8x128xf32>
    %cst_58 = arith.constant 2.000000e+01 : f32
    %130 = vector.broadcast %cst_58 : f32 to vector<8x128xf32>
    %131 = arith.minimumf %121, %130 : vector<8x128xf32>
    %132 = math.exp %131 : vector<8x128xf32>
    %133 = math.log1p %132 : vector<8x128xf32>
    %134 = arith.select %129, %121, %133 : vector<8x128xi1>, vector<8x128xf32>
    %135 = arith.select %127, %134, %121 : vector<8x128xi1>, vector<8x128xf32>
    %c0_59 = arith.constant 0 : index
    %c0_60 = arith.constant 0 : index
    %136 = vector.load %arg16[%c0_59, %c0_60] : memref<8x128xf32, #tpu.memory_space<vmem>>, vector<8x128xf32>
    tpu.vector_store %arg16[%c0_59, %c0_60], %135 {strides = array<i32>} : memref<8x128xf32, #tpu.memory_space<vmem>>, vector<8x128xf32>,
    return
  }
}

</mosaic_0001>

<bundles_post_ra>
// kernel: tpu_custom_call.1
= control target key start
LH: loop header
LB: loop body
LE: loop exit
PB: predicated region body
PF: predicated region fallthrough
CT: control target
= control target key end

     0   :  { %s2343_s0 = inlined_call_operand.hbm [shape: f32[8,32], index: 0, kind: input, shape index: {}]   ;;  %s2344_s1 = inlined_call_operand.hbm [shape: f32[8,48], index: 1, kind: input, shape index: {}]   ;;  %s2345_s2 = inlined_call_operand.hbm [shape: f32[8,40], index: 2, kind: input, shape index: {}]   ;;  %s2346_s3 = inlined_call_operand.hbm [shape: f32[8,16], index: 3, kind: input, shape index: {}]   ;;  %s2347_s4 = inlined_call_operand.hbm [shape: f32[32,160], index: 4, kind: input, shape index: {}]   ;;  %s2348_s5 = inlined_call_operand.hbm [shape: f32[48,160], index: 5, kind: input, shape index: {}]   ;;  %s2349_s6 = inlined_call_operand.hbm [shape: f32[40,160], index: 6, kind: input, shape index: {}]   ;;  %s2350_s7 = inlined_call_operand.hbm [shape: f32[16,160], index: 7, kind: input, shape index: {}]   ;;  %s2351_s8 = inlined_call_operand.hbm [shape: f32[160,128], index: 8, kind: input, shape index: {}]   ;;  %s2352_s9 = inlined_call_operand.hbm [shape: f32[160,128], index: 9, kind: input, shape index: {}]   ;;  %s2353_s10 = inlined_call_operand.hbm [shape: f32[160,128], index: 10, kind: input, shape index: {}]   ;;  %s2354_s11 = inlined_call_operand.hbm [shape: f32[160,128], index: 11, kind: input, shape index: {}]   ;;  %s2355_s12 = inlined_call_operand.hbm [shape: f32[128,128], index: 12, kind: input, shape index: {}]   ;;  %s2356_s13 = inlined_call_operand.hbm [shape: f32[128,128], index: 13, kind: input, shape index: {}]   ;;  %s2357_s14 = inlined_call_operand.hbm [shape: f32[128,128], index: 14, kind: input, shape index: {}]   ;;  %s2358_s15 = inlined_call_operand.hbm [shape: f32[12,160], index: 15, kind: input, shape index: {}]   ;;  %s2359_s16 = inlined_call_operand.hbm [shape: f32[8,128], index: 16, kind: output, shape index: {}]  }
   0x1   :  { %2360 = sst [smem:[#allocation39_spill]] %s2343_s0 }
   0x2   :  { %21 = vsyncpa [#allocation3], 0 }
   0x3   :  { %22 = vsyncpa [#allocation6], 0 }
   0x4   :  { %23 = vsyncpa [#allocation9], 0 }
   0x5   :  { %24 = vsyncpa [#allocation12], 0 }
   0x6   :  { %25 = vsyncpa [#allocation15], 0 }
   0x7   :  { %26 = vsyncpa [#allocation18], 0 }
   0x8   :  { %27 = vsyncpa [#allocation21], 0 }
   0x9   :  { %28 = vsyncpa [#allocation24], 0 }
   0xa   :  { %29 = vsyncpa [#allocation27], 0 }
   0xb   :  { %30 = vsyncpa [#allocation4], 0  ;;  %s1957_s21 = smov [#allocation5]   ;;  %s1958_s23 = smov [#allocation8]  }
   0xc   :  { %s47_s22 = sshll.u32 %s1957_s21, 4  ;;  %s67_s24 = sshll.u32 %s1958_s23, 4  ;;  %s48_s22 = int_to_ptr.vmem [resolvable:$true] %s47_s22  ;;  %s68_s24 = int_to_ptr.vmem [resolvable:$true] %s67_s24 }
   0xd   :  { %s1605_s25 = scalar_lea.vmem %s48_s22, 128  ;;  %p1610_p1 = scmp.lt.s32.totalorder %s48_s22, %s48_s22 }
   0xe   :  { %p1606_p0 = scmp.ne.s32.totalorder %s48_s22, %s1605_s25  ;;  %p1611_p2 = scmp.lt.s32.totalorder %s1605_s25, %s1605_s25 }
  0x10   :  { %p1612_p3 = por %p1611_p2, %p1610_p1 }
  0x12   :  { %p1613_p4 = pnand %p1612_p3, %p1606_p0 }
  0x14   :  { %1616 = shalt.err (!%p1613_p4)
}
  0x15   :  { %50 = dma.hbm_to_vmem [thread:$0]  %s2344_s1, 128, %s48_s22, [#allocation6]  }
  0x16   :  { %s1625_s28 = scalar_lea.vmem %s68_s24, 128  ;;  %p1630_p6 = scmp.lt.s32.totalorder %s68_s24, %s68_s24 }
  0x17   :  { %p1626_p5 = scmp.ne.s32.totalorder %s68_s24, %s1625_s28  ;;  %p1631_p7 = scmp.lt.s32.totalorder %s1625_s28, %s1625_s28 }
  0x19   :  { %p1632_p8 = por %p1631_p7, %p1630_p6 }
  0x1b   :  { %p1633_p9 = pnand %p1632_p8, %p1626_p5 }
  0x1d   :  { %1636 = shalt.err (!%p1633_p9)
}
  0x1e   :  { %70 = dma.hbm_to_vmem [thread:$0]  %s2346_s3, 128, %s68_s24, [#allocation9]  }
  0x1f   :  { %s1959_s0 = smov [#allocation11]   ;;  %s1960_s18 = smov [#allocation14]  }
  0x20   :  { %s88_s17 = sshll.u32 %s1959_s0, 4  ;;  %s112_s19 = sshll.u32 %s1960_s18, 4  ;;  %s89_s17 = int_to_ptr.vmem [resolvable:$true] %s88_s17  ;;  %s113_s19 = int_to_ptr.vmem [resolvable:$true] %s112_s19 }
  0x21   :  { %s1645_s20 = scalar_lea.vmem %s89_s17, 1536  ;;  %p1650_p11 = scmp.lt.s32.totalorder %s89_s17, %s89_s17 }
  0x22   :  { %p1646_p10 = scmp.ne.s32.totalorder %s89_s17, %s1645_s20  ;;  %p1651_p12 = scmp.lt.s32.totalorder %s1645_s20, %s1645_s20 }
  0x24   :  { %p1652_p13 = por %p1651_p12, %p1650_p11 }
  0x26   :  { %p1653_p0 = pnand %p1652_p13, %p1646_p10 }
  0x28   :  { %1656 = shalt.err (!%p1653_p0)
}
  0x29   :  { %s1961_s1 = smov 256   ;;  %s1962_s21 = smov 16  }
  0x2a   :  { %94 = dma.hbm_to_vmem [thread:$0]  %s2348_s5, 1536, %s89_s17, [#allocation12], %s1961_s1, %s1961_s1, %s1962_s21  }
  0x2b   :  { %s1665_s23 = scalar_lea.vmem %s113_s19, 512  ;;  %p1670_p2 = scmp.lt.s32.totalorder %s113_s19, %s113_s19 }
  0x2c   :  { %p1666_p1 = scmp.ne.s32.totalorder %s113_s19, %s1665_s23  ;;  %p1671_p3 = scmp.lt.s32.totalorder %s1665_s23, %s1665_s23 }
  0x2e   :  { %p1672_p4 = por %p1671_p3, %p1670_p2 }
  0x30   :  { %p1673_p5 = pnand %p1672_p4, %p1666_p1 }
  0x32   :  { %1676 = shalt.err (!%p1673_p5)
}
  0x33   :  { %118 = dma.hbm_to_vmem [thread:$0]  %s2350_s7, 512, %s113_s19, [#allocation15], %s1961_s1, %s1961_s1, %s1962_s21  }
  0x34   :  { %s1963_s26 = smov [#allocation17]   ;;  %s1964_s28 = smov [#allocation20]  }
  0x35   :  { %s136_s27 = sshll.u32 %s1963_s26, 4  ;;  %s160_s29 = sshll.u32 %s1964_s28, 4  ;;  %s137_s27 = int_to_ptr.vmem [resolvable:$true] %s136_s27  ;;  %s161_s29 = int_to_ptr.vmem [resolvable:$true] %s160_s29 }
  0x36   :  { %s1685_s5 = scalar_lea.vmem %s137_s27, 2560  ;;  %p1690_p7 = scmp.lt.s32.totalorder %s137_s27, %s137_s27 }
  0x37   :  { %p1686_p6 = scmp.ne.s32.totalorder %s137_s27, %s1685_s5  ;;  %p1691_p8 = scmp.lt.s32.totalorder %s1685_s5, %s1685_s5 }
  0x39   :  { %p1692_p9 = por %p1691_p8, %p1690_p7 }
  0x3b   :  { %p1693_p10 = pnand %p1692_p9, %p1686_p6 }
  0x3d   :  { %1696 = shalt.err (!%p1693_p10)
}
  0x3e   :  { %s1965_s30 = smov 128   ;;  %s1966_s0 = smov 8  }
  0x3f   :  { %142 = dma.hbm_to_vmem [thread:$0]  %s2352_s9, 2560, %s137_s27, [#allocation18], %s1965_s30, %s1965_s30, %s1966_s0  }
  0x40   :  { %s1705_s18 = scalar_lea.vmem %s161_s29, 2560  ;;  %p1710_p12 = scmp.lt.s32.totalorder %s161_s29, %s161_s29 }
  0x41   :  { %p1706_p11 = scmp.ne.s32.totalorder %s161_s29, %s1705_s18  ;;  %p1711_p13 = scmp.lt.s32.totalorder %s1705_s18, %s1705_s18 }
  0x43   :  { %p1712_p0 = por %p1711_p13, %p1710_p12 }
  0x45   :  { %p1713_p1 = pnand %p1712_p0, %p1706_p11 }
  0x47   :  { %1716 = shalt.err (!%p1713_p1)
}
  0x48   :  { %166 = dma.hbm_to_vmem [thread:$0]  %s2354_s11, 2560, %s161_s29, [#allocation21], %s1965_s30, %s1965_s30, %s1966_s0  }
  0x49   :  { %s1967_s22 = smov [#allocation23]   ;;  %s1968_s23 = smov [#allocation2]  }
  0x4a   :  { %s184_s3 = sshll.u32 %s1967_s22, 4  ;;  %s37_s24 = sshll.u32 %s1968_s23, 4  ;;  %s185_s3 = int_to_ptr.vmem [resolvable:$true] %s184_s3  ;;  %s38_s24 = int_to_ptr.vmem [resolvable:$true] %s37_s24 }
  0x4b   :  { %s1725_s9 = scalar_lea.vmem %s185_s3, 2048  ;;  %p1730_p3 = scmp.lt.s32.totalorder %s185_s3, %s185_s3 }
  0x4c   :  { %p1726_p2 = scmp.ne.s32.totalorder %s185_s3, %s1725_s9  ;;  %p1731_p4 = scmp.lt.s32.totalorder %s1725_s9, %s1725_s9 }
  0x4e   :  { %p1732_p5 = por %p1731_p4, %p1730_p3 }
  0x50   :  { %p1733_p6 = pnand %p1732_p5, %p1726_p2 }
  0x52   :  { %1736 = shalt.err (!%p1733_p6)
}
  0x53   :  { %190 = dma.hbm_to_vmem [thread:$0]  %s2356_s13, 2048, %s185_s3, [#allocation24], %s1965_s30, %s1965_s30, %s1966_s0  }
  0x54   :  { %s1745_s11 = scalar_lea.vmem %s38_s24, 128  ;;  %p1750_p8 = scmp.lt.s32.totalorder %s38_s24, %s38_s24 }
  0x55   :  { %p1746_p7 = scmp.ne.s32.totalorder %s38_s24, %s1745_s11  ;;  %p1751_p9 = scmp.lt.s32.totalorder %s1745_s11, %s1745_s11 }
  0x57   :  { %p1752_p10 = por %p1751_p9, %p1750_p8 }
  0x59   :  { %p1753_p11 = pnand %p1752_p10, %p1746_p7 }
  0x5b   :  { %1756 = shalt.err (!%p1753_p11)
}
  0x5c   :  { %s2361_s29 = sld [smem:[#allocation39_spill]]  ;;  %s1969_s5 = smov [#allocation7]  }
  0x5d   :  { %s57_s17 = sshll.u32 %s1969_s5, 4  ;;  %s1970_s7 = smov [#allocation10]   ;;  %s58_s17 = int_to_ptr.vmem [resolvable:$true] %s57_s17 }
  0x5e   :  { %s76_s18 = sshll.u32 %s1970_s7, 4  ;;  %s1765_s19 = scalar_lea.vmem %s58_s17, 128  ;;  %s77_s18 = int_to_ptr.vmem [resolvable:$true] %s76_s18 }
  0x5f   :  { %p1766_p12 = scmp.ne.s32.totalorder %s58_s17, %s1765_s19  ;;  %p1770_p13 = scmp.lt.s32.totalorder %s58_s17, %s58_s17 }
  0x60   :  { %p1771_p0 = scmp.lt.s32.totalorder %s1765_s19, %s1765_s19 }
  0x62   :  { %40 = dma.hbm_to_vmem [thread:$0]  %s2361_s29, 128, %s38_s24, [#allocation3]  }
  0x63   :  { %p1772_p1 = por %p1771_p0, %p1770_p13 }
  0x65   :  { %p1773_p2 = pnand %p1772_p1, %p1766_p12 }
  0x67   :  { %1776 = shalt.err (!%p1773_p2)
}
  0x68   :  { %60 = dma.hbm_to_vmem [thread:$0]  %s2345_s2, 128, %s58_s17, [#allocation6]  }
  0x69   :  { %s1785_s22 = scalar_lea.vmem %s77_s18, 1024  ;;  %p1790_p4 = scmp.lt.s32.totalorder %s77_s18, %s77_s18 }
  0x6a   :  { %p1786_p3 = scmp.ne.s32.totalorder %s77_s18, %s1785_s22  ;;  %p1791_p5 = scmp.lt.s32.totalorder %s1785_s22, %s1785_s22 }
  0x6c   :  { %p1792_p6 = por %p1791_p5, %p1790_p4 }
  0x6e   :  { %p1793_p7 = pnand %p1792_p6, %p1786_p3 }
  0x70   :  { %1796 = shalt.err (!%p1793_p7)
}
  0x71   :  { %82 = dma.hbm_to_vmem [thread:$0]  %s2347_s4, 1024, %s77_s18, [#allocation9], %s1961_s1, %s1961_s1, %s1962_s21  }
  0x72   :  { %s1971_s24 = smov [#allocation13]   ;;  %s1972_s25 = smov [#allocation16]  }
  0x73   :  { %s100_s9 = sshll.u32 %s1971_s24, 4  ;;  %s124_s26 = sshll.u32 %s1972_s25, 4  ;;  %s101_s9 = int_to_ptr.vmem [resolvable:$true] %s100_s9  ;;  %s125_s26 = int_to_ptr.vmem [resolvable:$true] %s124_s26 }
  0x74   :  { %s1805_s2 = scalar_lea.vmem %s101_s9, 1280  ;;  %p1810_p9 = scmp.lt.s32.totalorder %s101_s9, %s101_s9 }
  0x75   :  { %p1806_p8 = scmp.ne.s32.totalorder %s101_s9, %s1805_s2  ;;  %p1811_p10 = scmp.lt.s32.totalorder %s1805_s2, %s1805_s2 }
  0x77   :  { %p1812_p11 = por %p1811_p10, %p1810_p9 }
  0x79   :  { %p1813_p12 = pnand %p1812_p11, %p1806_p8 }
  0x7b   :  { %1816 = shalt.err (!%p1813_p12)
}
  0x7c   :  { %106 = dma.hbm_to_vmem [thread:$0]  %s2349_s6, 1280, %s101_s9, [#allocation12], %s1961_s1, %s1961_s1, %s1962_s21  }
  0x7d   :  { %s1825_s4 = scalar_lea.vmem %s125_s26, 2560  ;;  %p1830_p0 = scmp.lt.s32.totalorder %s125_s26, %s125_s26 }
  0x7e   :  { %p1826_p13 = scmp.ne.s32.totalorder %s125_s26, %s1825_s4  ;;  %p1831_p1 = scmp.lt.s32.totalorder %s1825_s4, %s1825_s4 }
  0x80   :  { %p1832_p2 = por %p1831_p1, %p1830_p0 }
  0x82   :  { %p1833_p3 = pnand %p1832_p2, %p1826_p13 }
  0x84   :  { %1836 = shalt.err (!%p1833_p3)
}
  0x85   :  { %130 = dma.hbm_to_vmem [thread:$0]  %s2351_s8, 2560, %s125_s26, [#allocation15], %s1965_s30, %s1965_s30, %s1966_s0  }
  0x86   :  { %s1973_s5 = smov [#allocation19]   ;;  %s1974_s7 = smov [#allocation22]  }
  0x87   :  { %s148_s17 = sshll.u32 %s1973_s5, 4  ;;  %s172_s18 = sshll.u32 %s1974_s7, 4  ;;  %s149_s17 = int_to_ptr.vmem [resolvable:$true] %s148_s17  ;;  %s173_s18 = int_to_ptr.vmem [resolvable:$true] %s172_s18 }
  0x88   :  { %s1845_s6 = scalar_lea.vmem %s149_s17, 2560  ;;  %p1850_p5 = scmp.lt.s32.totalorder %s149_s17, %s149_s17 }
  0x89   :  { %p1846_p4 = scmp.ne.s32.totalorder %s149_s17, %s1845_s6  ;;  %p1851_p6 = scmp.lt.s32.totalorder %s1845_s6, %s1845_s6 }
  0x8b   :  { %p1852_p7 = por %p1851_p6, %p1850_p5 }
  0x8d   :  { %p1853_p8 = pnand %p1852_p7, %p1846_p4 }
  0x8f   :  { %1856 = shalt.err (!%p1853_p8)
}
  0x90   :  { %154 = dma.hbm_to_vmem [thread:$0]  %s2353_s10, 2560, %s149_s17, [#allocation18], %s1965_s30, %s1965_s30, %s1966_s0  }
  0x91   :  { %s1865_s8 = scalar_lea.vmem %s173_s18, 2048  ;;  %p1870_p10 = scmp.lt.s32.totalorder %s173_s18, %s173_s18 }
  0x92   :  { %p1866_p9 = scmp.ne.s32.totalorder %s173_s18, %s1865_s8  ;;  %p1871_p11 = scmp.lt.s32.totalorder %s1865_s8, %s1865_s8 }
  0x94   :  { %p1872_p12 = por %p1871_p11, %p1870_p10 }
  0x96   :  { %p1873_p13 = pnand %p1872_p12, %p1866_p9 }
  0x98   :  { %1876 = shalt.err (!%p1873_p13)
}
  0x99   :  { %178 = dma.hbm_to_vmem [thread:$0]  %s2355_s12, 2048, %s173_s18, [#allocation21], %s1965_s30, %s1965_s30, %s1966_s0  }
  0x9a   :  { %s1975_s3 = smov [#allocation25]   ;;  %s1976_s24 = smov [#allocation26]  }
  0x9b   :  { %s196_s23 = sshll.u32 %s1975_s3, 4  ;;  %s208_s9 = sshll.u32 %s1976_s24, 4  ;;  %s197_s23 = int_to_ptr.vmem [resolvable:$true] %s196_s23  ;;  %s209_s9 = int_to_ptr.vmem [resolvable:$true] %s208_s9 }
  0x9c   :  { %s1885_s10 = scalar_lea.vmem %s197_s23, 2048  ;;  %p1890_p1 = scmp.lt.s32.totalorder %s197_s23, %s197_s23 }
  0x9d   :  { %p1886_p0 = scmp.ne.s32.totalorder %s197_s23, %s1885_s10  ;;  %p1891_p2 = scmp.lt.s32.totalorder %s1885_s10, %s1885_s10 }
  0x9f   :  { %p1892_p3 = por %p1891_p2, %p1890_p1 }
  0xa1   :  { %p1893_p4 = pnand %p1892_p3, %p1886_p0 }
  0xa3   :  { %1896 = shalt.err (!%p1893_p4)
}
  0xa4   :  { %202 = dma.hbm_to_vmem [thread:$0]  %s2357_s14, 2048, %s197_s23, [#allocation24], %s1965_s30, %s1965_s30, %s1966_s0  }
  0xa5   :  { %s1905_s12 = scalar_lea.vmem %s209_s9, 512  ;;  %p1910_p6 = scmp.lt.s32.totalorder %s209_s9, %s209_s9 }
  0xa6   :  { %p1906_p5 = scmp.ne.s32.totalorder %s209_s9, %s1905_s12  ;;  %p1911_p7 = scmp.lt.s32.totalorder %s1905_s12, %s1905_s12 }
  0xa8   :  { %p1912_p8 = por %p1911_p7, %p1910_p6 }
  0xaa   :  { %p1913_p9 = pnand %p1912_p8, %p1906_p5 }
  0xac   :  { %1916 = shalt.err (!%p1913_p9)
}
  0xad   :  { %214 = dma.hbm_to_vmem [thread:$0]  %s2358_s15, 512, %s209_s9, [#allocation27], %s1961_s1, %s1961_s1, %s1962_s21  }
  0xae   :  { %1937 = dma.done.wait [#allocation3], 128  }
  0xaf   :  { %1938 = vsyncadd [#allocation3], 4294967168 }
  0xb0   :  { %1939 = dma.done.wait [#allocation6], 256  }
  0xb1   :  { %1940 = vsyncadd [#allocation6], 4294967040 }
  0xb2   :  { %1941 = dma.done.wait [#allocation9], 1152  }
  0xb3   :  { %1942 = vsyncadd [#allocation9], 4294966144 }
  0xb4   :  { %1943 = dma.done.wait [#allocation12], 2816  }
  0xb5   :  { %1944 = vsyncadd [#allocation12], 4294964480 }
  0xb6   :  { %1945 = dma.done.wait [#allocation15], 3072  }
  0xb7   :  { %1946 = vsyncadd [#allocation15], 4294964224 }
  0xb8   :  { %1947 = dma.done.wait [#allocation18], 5120  }
  0xb9   :  { %1948 = vsyncadd [#allocation18], 4294962176 }
  0xba   :  { %1949 = dma.done.wait [#allocation21], 4608  }
  0xbb   :  { %1950 = vsyncadd [#allocation21], 4294962688 }
  0xbc   :  { %1951 = dma.done.wait [#allocation24], 4096  }
  0xbd   :  { %1952 = vsyncadd [#allocation24], 4294963200 }
  0xbe   :  { %1953 = dma.done.wait [#allocation27], 512  }
  0xbf   :  { %1954 = vsyncadd [#allocation27], 4294966784  ;;  %v1977_v0 = vmov 0.0   ;;  %v274_v1 = vld [vmem:[#allocation10 + $0x38] sm:$0xff]  ;;  %v273_v2 = vld [vmem:[#allocation10 + $0x30] sm:$0xff]  ;;  %vm283_vm0 = vcmask 261120  }
  0xc0   :  { %351 = vmatprep.mubr.f32.mxu0 %v1977_v0  ;;  %570 = vmatprep.subr.mxu1 %v1977_v0  ;;  %v272_v3 = vld [vmem:[#allocation10 + $0x28] sm:$0xff]  ;;  %v271_v4 = vld [vmem:[#allocation10 + $0x20] sm:$0xff]  ;;  %v270_v5 = vld [vmem:[#allocation10 + $0x18] sm:$0xff]  ;;  %vm399_vm1 = vcmask 392192   ;;  %vm659_vm2 = vcmask 326656   ;;  %vm841_vm3 = vcmask 130048  }
  0xc1   :  { %311 = vmatprep.subr.mxu0 %v274_v1  ;;  %v269_v6 = vld [vmem:[#allocation10 + $0x10] sm:$0xff]  ;;  %v268_v7 = vld [vmem:[#allocation10 + $0x8] sm:$0xff]  ;;  %v267_v8 = vld [vmem:[#allocation10] sm:$0xff]  ;;  %v275_v1 = vlaneseq  ;;  %vm1978_vm4 = vmmov 0   ;;  %s1979_s14 = smov [#allocation28]  }
  0xc2   :  { %312 = vmatpush1.msra.mxu0 %v273_v2  ;;  %v266_v9 = vld [vmem:[#allocation2] sm:$0xff]  ;;  %v390_v10 = vld [vmem:[#allocation11 + $0x58] sm:$0xff]  ;;  %v389_v11 = vld [vmem:[#allocation11 + $0x50] sm:$0xff]  ;;  %s1381_s15 = sshll.u32 %s1979_s14, 4  ;;  %s1382_s15 = int_to_ptr.vmem [resolvable:$true] %s1381_s15 }
  0xc3   :  { %313 = vmatprep.subr.mxu0 %v272_v3  ;;  %v373_v12 = vld [vmem:[#allocation16 + $0x78] sm:$0xff]  ;;  %v387_v14 = vld [vmem:[#allocation11 + $0x40] sm:$0xff]  ;;  %v386_v16 = vld [vmem:[#allocation11 + $0x38] sm:$0xff]  ;;  %v2194_v2 = vshrl.u32 %v275_v1, 7  ;;  %s1917_s1 = scalar_lea.vmem %s1382_s15, 128  ;;  %p1922_p11 = scmp.lt.s32.totalorder %s1382_s15, %s1382_s15 }
  0xc4   :  { %314 = vmatpush1.msra.mxu0 %v271_v4  ;;  %v388_v13 = vld [vmem:[#allocation11 + $0x48] sm:$0xff]  ;;  %571 = vmatpush1.msra.mxu1 %v373_v12  ;;  %v372_v15 = vld [vmem:[#allocation16 + $0x70] sm:$0xff]  ;;  %v385_v17 = vld [vmem:[#allocation11 + $0x30] sm:$0xff]  ;;  %p1918_p10 = scmp.ne.s32.totalorder %s1382_s15, %s1917_s1  ;;  %p1923_p12 = scmp.lt.s32.totalorder %s1917_s1, %s1917_s1 }
  0xc5   :  { %315 = vmatprep.subr.mxu0 %v270_v5  ;;  %572 = vmatprep.subr.mxu1 %v1977_v0  ;;  %v371_v18 = vld [vmem:[#allocation16 + $0x68] sm:$0xff]  ;;  %v384_v19 = vld [vmem:[#allocation11 + $0x28] sm:$0xff]  ;;  %v383_v20 = vld [vmem:[#allocation11 + $0x20] sm:$0xff]  ;;  %v2197_v3 = vsub.s32 0, %v2194_v2 }
  0xc6   :  { %316 = vmatpush1.msra.mxu0 %v269_v6  ;;  %573 = vmatpush1.msra.mxu1 %v372_v15  ;;  %v370_v21 = vld [vmem:[#allocation16 + $0x60] sm:$0xff]  ;;  %v382_v22 = vld [vmem:[#allocation11 + $0x18] sm:$0xff]  ;;  %v369_v24 = vld [vmem:[#allocation16 + $0x58] sm:$0xff]  ;;  %p1924_p13 = por %p1923_p12, %p1922_p11 }
  0xc7   :  { %317 = vmatprep.subr.mxu0 %v268_v7  ;;  %574 = vmatprep.subr.mxu1 %v1977_v0  ;;  %v381_v23 = vld [vmem:[#allocation11 + $0x10] sm:$0xff]  ;;  %v380_v25 = vld [vmem:[#allocation11 + $0x8] sm:$0xff]  ;;  %v379_v26 = vld [vmem:[#allocation11] sm:$0xff] }
  0xc8   :  { %318 = vmatpush1.msra.mxu0 %v267_v8  ;;  %575 = vmatpush1.msra.mxu1 %v371_v18  ;;  %v368_v27 = vld [vmem:[#allocation16 + $0x50] sm:$0xff]  ;;  %v378_v28 = vld [vmem:[#allocation5] sm:$0xff]  ;;  %v367_v30 = vld [vmem:[#allocation16 + $0x48] sm:$0xff]  ;;  %p1925_p0 = pnand %p1924_p13, %p1918_p10 }
  0xc9   :  { %1398 = vmatmul.mubr.msk.f32.vlgmr.msra.gmra.mxu0 %vm283_vm0, %v266_v9  ;;  %423 = vmatprep.subr.mxu0 %v390_v10  ;;  %v489_v29 = vld [vmem:[#allocation17 + $0x78] sm:$0xff]  ;;  %v488_v31 = vld [vmem:[#allocation17 + $0x70] sm:$0xff]  ;;  %v366_v32 = vld [vmem:[#allocation16 + $0x40] sm:$0xff] }
  0xca   :  { %424 = vmatpush1.msra.mxu0 %v389_v11  ;;  %467 = vmatprep.mubr.f32.mxu0 %v1977_v0  ;;  %v487_v33 = vld [vmem:[#allocation17 + $0x68] sm:$0xff]  ;;  %v365_v34 = vld [vmem:[#allocation16 + $0x38] sm:$0xff]  ;;  %v486_v35 = vld [vmem:[#allocation17 + $0x60] sm:$0xff] }
  0xcb   :  { %425 = vmatprep.subr.mxu0 %v388_v13  ;;  %576 = vmatprep.subr.mxu1 %v1977_v0  ;;  %v364_v36 = vld [vmem:[#allocation16 + $0x30] sm:$0xff]  ;;  %v485_v37 = vld [vmem:[#allocation17 + $0x58] sm:$0xff]  ;;  %v363_v38 = vld [vmem:[#allocation16 + $0x28] sm:$0xff] }
  0xcc   :  { %426 = vmatpush1.msra.mxu0 %v387_v14  ;;  %577 = vmatpush1.msra.mxu1 %v370_v21  ;;  %v484_v39 = vld [vmem:[#allocation17 + $0x50] sm:$0xff]  ;;  %v362_v40 = vld [vmem:[#allocation16 + $0x20] sm:$0xff]  ;;  %v483_v41 = vld [vmem:[#allocation17 + $0x48] sm:$0xff]  ;;  %v2209_v14 = vsub.s32 1, %v2194_v2 }
  0xcd   :  { %427 = vmatprep.subr.mxu0 %v386_v16  ;;  %578 = vmatprep.subr.mxu1 %v1977_v0  ;;  %v361_v42 = vld [vmem:[#allocation16 + $0x18] sm:$0xff]  ;;  %v482_v43 = vld [vmem:[#allocation17 + $0x40] sm:$0xff]  ;;  %v360_v44 = vld [vmem:[#allocation16 + $0x10] sm:$0xff] }
  0xce   :  { %428 = vmatpush1.msra.mxu0 %v385_v17  ;;  %579 = vmatpush1.msra.mxu1 %v369_v24  ;;  %v481_v45 = vld [vmem:[#allocation17 + $0x38] sm:$0xff]  ;;  %v359_v46 = vld [vmem:[#allocation16 + $0x8] sm:$0xff]  ;;  %v480_v47 = vld [vmem:[#allocation17 + $0x30] sm:$0xff] }
  0xcf   :  { %429 = vmatprep.subr.mxu0 %v384_v19  ;;  %580 = vmatprep.subr.mxu1 %v1977_v0  ;;  %v358_v48 = vld [vmem:[#allocation16] sm:$0xff]  ;;  %v479_v49 = vld [vmem:[#allocation17 + $0x28] sm:$0xff]  ;;  %v377_v50 = vld [vmem:[#allocation16 + $0x98] sm:$0xff] }
  0xd0   :  { %430 = vmatpush1.msra.mxu0 %v383_v20  ;;  %581 = vmatpush1.msra.mxu1 %v368_v27  ;;  %v478_v51 = vld [vmem:[#allocation17 + $0x20] sm:$0xff]  ;;  %v376_v52 = vld [vmem:[#allocation16 + $0x90] sm:$0xff]  ;;  %v477_v53 = vld [vmem:[#allocation17 + $0x18] sm:$0xff] }
  0xd1   :  { %431 = vmatprep.subr.mxu0 %v382_v22  ;;  %582 = vmatprep.subr.mxu1 %v1977_v0  ;;  %v375_v54 = vld [vmem:[#allocation16 + $0x88] sm:$0xff]  ;;  %v476_v55 = vld [vmem:[#allocation17 + $0x10] sm:$0xff]  ;;  %v374_v56 = vld [vmem:[#allocation16 + $0x80] sm:$0xff] }
  0xd2   :  { %432 = vmatpush1.msra.mxu0 %v381_v23  ;;  %583 = vmatpush1.msra.mxu1 %v367_v30  ;;  %v475_v57 = vld [vmem:[#allocation17 + $0x8] sm:$0xff]  ;;  %v474_v58 = vld [vmem:[#allocation17] sm:$0xff]  ;;  %v493_v59 = vld [vmem:[#allocation17 + $0x98] sm:$0xff] }
  0xd3   :  { %433 = vmatprep.subr.mxu0 %v380_v25  ;;  %584 = vmatprep.subr.mxu1 %v1977_v0  ;;  %v492_v60 = vld [vmem:[#allocation17 + $0x90] sm:$0xff]  ;;  %v491_v61 = vld [vmem:[#allocation17 + $0x88] sm:$0xff]  ;;  %v490_v62 = vld [vmem:[#allocation17 + $0x80] sm:$0xff] }
  0xd4   :  { %434 = vmatpush1.msra.mxu0 %v379_v26  ;;  %585 = vmatpush1.msra.mxu1 %v366_v32  ;;  %v650_v63 = vld [vmem:[#allocation13 + $0x48] sm:$0xff]  ;;  %v2199_v4 = vld [vmem:[#allocation26 + $0x8] sm:$0xff]  ;;  %v2201_v5 = vld [vmem:[#allocation26] sm:$0xff] }
  0xd5   :  { %1399 = vmatmul.mubr.msk.f32.vlgmr.msra.gmra.mxu0 %vm399_vm1, %v378_v28  ;;  %497 = vmatprep.subr.mxu0 %v1977_v0  ;;  %v282_v6 = vrot.slane %v2199_v4, %v2197_v3  ;;  %v278_v7 = vrot.slane %v2201_v5, %v2197_v3  ;;  %v749_v12 = vld [vmem:[#allocation19 + $0x78] sm:$0xff]  ;;  %v748_v13 = vld [vmem:[#allocation19 + $0x70] sm:$0xff]  ;;  %v747_v15 = vld [vmem:[#allocation19 + $0x68] sm:$0xff]  ;;  %v398_v17 = vrot.slane %v2199_v4, %v2209_v14 }
  0xd6   :  { %498 = vmatpush1.msra.mxu0 %v489_v29  ;;  %586 = vmatprep.subr.mxu1 %v1977_v0  ;;  %v746_v16 = vld [vmem:[#allocation19 + $0x60] sm:$0xff]  ;;  %v394_v18 = vrot.slane %v2201_v5, %v2209_v14  ;;  %v745_v20 = vld [vmem:[#allocation19 + $0x58] sm:$0xff]  ;;  %v744_v22 = vld [vmem:[#allocation19 + $0x50] sm:$0xff] }
  0xd7   :  { %499 = vmatprep.subr.mxu0 %v1977_v0  ;;  %587 = vmatpush1.msra.mxu1 %v365_v34  ;;  %v649_v25 = vld [vmem:[#allocation13 + $0x40] sm:$0xff]  ;;  %v648_v26 = vld [vmem:[#allocation13 + $0x38] sm:$0xff]  ;;  %v647_v27 = vld [vmem:[#allocation13 + $0x30] sm:$0xff] }
  0xd8   :  { %500 = vmatpush1.msra.mxu0 %v488_v31  ;;  %588 = vmatprep.subr.mxu1 %v1977_v0  ;;  %v646_v28 = vld [vmem:[#allocation13 + $0x28] sm:$0xff]  ;;  %v645_v29 = vld [vmem:[#allocation13 + $0x20] sm:$0xff]  ;;  %v644_v30 = vld [vmem:[#allocation13 + $0x18] sm:$0xff] }
  0xd9   :  { %501 = vmatprep.subr.mxu0 %v1977_v0  ;;  %589 = vmatpush1.msra.mxu1 %v364_v36  ;;  %v643_v31 = vld [vmem:[#allocation13 + $0x10] sm:$0xff]  ;;  %v642_v32 = vld [vmem:[#allocation13 + $0x8] sm:$0xff]  ;;  %v831_v36 = vld [vmem:[#allocation14 + $0x10] sm:$0xff] }
  0xda   :  { %502 = vmatpush1.msra.mxu0 %v487_v33  ;;  %590 = vmatprep.subr.mxu1 %v1977_v0  ;;  %v641_v33 = vld [vmem:[#allocation13] sm:$0xff]  ;;  %v640_v34 = vld [vmem:[#allocation7] sm:$0xff] }
  0xdb   :  { %503 = vmatprep.subr.mxu0 %v1977_v0  ;;  %591 = vmatpush1.msra.mxu1 %v363_v38  ;;  %v829_v38 = vld [vmem:[#allocation14] sm:$0xff] }
  0xdc   :  { %504 = vmatpush1.msra.mxu0 %v486_v35  ;;  %592 = vmatprep.subr.mxu1 %v1977_v0  ;;  %v832_v35 = vld [vmem:[#allocation14 + $0x18] sm:$0xff] }
  0xdd   :  { %505 = vmatprep.subr.mxu0 %v1977_v0  ;;  %593 = vmatpush1.msra.mxu1 %v362_v40  ;;  %v931_v40 = vld [vmem:[#allocation20 + $0x78] sm:$0xff] }
  0xde   :  { %506 = vmatpush1.msra.mxu0 %v485_v37  ;;  %594 = vmatprep.subr.mxu1 %v1977_v0  ;;  %v830_v37 = vld [vmem:[#allocation14 + $0x8] sm:$0xff] }
  0xdf   :  { %507 = vmatprep.subr.mxu0 %v1977_v0  ;;  %595 = vmatpush1.msra.mxu1 %v361_v42  ;;  %v929_v42 = vld [vmem:[#allocation20 + $0x68] sm:$0xff] }
  0xe0   :  { %508 = vmatpush1.msra.mxu0 %v484_v39  ;;  %596 = vmatprep.subr.mxu1 %v1977_v0  ;;  %v828_v39 = vld [vmem:[#allocation8] sm:$0xff] }
  0xe1   :  { %509 = vmatprep.subr.mxu0 %v1977_v0  ;;  %597 = vmatpush1.msra.mxu1 %v360_v44  ;;  %v743_v44 = vld [vmem:[#allocation19 + $0x48] sm:$0xff] }
  0xe2   :  { %510 = vmatpush1.msra.mxu0 %v483_v41  ;;  %598 = vmatprep.subr.mxu1 %v1977_v0  ;;  %v930_v41 = vld [vmem:[#allocation20 + $0x70] sm:$0xff] }
  0xe3   :  { %511 = vmatprep.subr.mxu0 %v1977_v0  ;;  %599 = vmatpush1.msra.mxu1 %v359_v46  ;;  %v742_v46 = vld [vmem:[#allocation19 + $0x40] sm:$0xff] }
  0xe4   :  { %512 = vmatpush1.msra.mxu0 %v482_v43  ;;  %600 = vmatprep.subr.mxu1 %v1977_v0  ;;  %v928_v43 = vld [vmem:[#allocation20 + $0x60] sm:$0xff] }
  0xe5   :  { %513 = vmatprep.subr.mxu0 %v1977_v0  ;;  %601 = vmatpush1.msra.mxu1 %v358_v48  ;;  %v741_v48 = vld [vmem:[#allocation19 + $0x38] sm:$0xff] }
  0xe6   :  { %514 = vmatpush1.msra.mxu0 %v481_v45  ;;  %626 = vmatprep.subr.mxu1 %v1977_v0  ;;  %v927_v45 = vld [vmem:[#allocation20 + $0x58] sm:$0xff] }
  0xe7   :  { %515 = vmatprep.subr.mxu0 %v1977_v0  ;;  %627 = vmatpush2.msra.mxu1 %v377_v50  ;;  %v740_v50 = vld [vmem:[#allocation19 + $0x30] sm:$0xff] }
  0xe8   :  { %516 = vmatpush1.msra.mxu0 %v480_v47  ;;  %628 = vmatprep.subr.mxu1 %v1977_v0  ;;  %v926_v47 = vld [vmem:[#allocation20 + $0x50] sm:$0xff] }
  0xe9   :  { %517 = vmatprep.subr.mxu0 %v1977_v0  ;;  %629 = vmatpush2.msra.mxu1 %v376_v52  ;;  %v739_v52 = vld [vmem:[#allocation19 + $0x28] sm:$0xff] }
  0xea   :  { %518 = vmatpush1.msra.mxu0 %v479_v49  ;;  %630 = vmatprep.subr.mxu1 %v1977_v0  ;;  %v925_v49 = vld [vmem:[#allocation20 + $0x48] sm:$0xff] }
  0xeb   :  { %519 = vmatprep.subr.mxu0 %v1977_v0  ;;  %631 = vmatpush2.msra.mxu1 %v375_v54  ;;  %v738_v54 = vld [vmem:[#allocation19 + $0x20] sm:$0xff] }
  0xec   :  { %520 = vmatpush1.msra.mxu0 %v478_v51  ;;  %632 = vmatprep.subr.mxu1 %v1977_v0  ;;  %v924_v51 = vld [vmem:[#allocation20 + $0x40] sm:$0xff] }
  0xed   :  { %521 = vmatprep.subr.mxu0 %v1977_v0  ;;  %633 = vmatpush2.msra.mxu1 %v374_v56  ;;  %v737_v56 = vld [vmem:[#allocation19 + $0x18] sm:$0xff] }
  0xee   :  { %522 = vmatpush1.msra.mxu0 %v477_v53  ;;  %757 = vmatprep.subr.mxu1 %v1977_v0  ;;  %v923_v53 = vld [vmem:[#allocation20 + $0x38] sm:$0xff] }
  0xef   :  { %523 = vmatprep.subr.mxu0 %v1977_v0 }
  0xf0   :  { %524 = vmatpush1.msra.mxu0 %v476_v55  ;;  %v922_v55 = vld [vmem:[#allocation20 + $0x30] sm:$0xff] }
  0xf1   :  { %525 = vmatprep.subr.mxu0 %v1977_v0 }
  0xf2   :  { %526 = vmatpush1.msra.mxu0 %v475_v57  ;;  %v921_v57 = vld [vmem:[#allocation20 + $0x28] sm:$0xff] }
  0xf3   :  { %527 = vmatprep.subr.mxu0 %v1977_v0 }
  0xf4   :  { %528 = vmatpush1.msra.mxu0 %v474_v58  ;;  %v736_v58 = vld [vmem:[#allocation19 + $0x10] sm:$0xff] }
  0xf5   :  { %553 = vmatprep.subr.mxu0 %v1977_v0 }
  0xf6   :  { %554 = vmatpush2.msra.mxu0 %v493_v59  ;;  %v920_v59 = vld [vmem:[#allocation20 + $0x20] sm:$0xff] }
  0xf7   :  { %555 = vmatprep.subr.mxu0 %v1977_v0 }
  0xf8   :  { %556 = vmatpush2.msra.mxu0 %v492_v60  ;;  %v735_v60 = vld [vmem:[#allocation19 + $0x8] sm:$0xff] }
  0xf9   :  { %557 = vmatprep.subr.mxu0 %v1977_v0 }
  0xfa   :  { %558 = vmatpush2.msra.mxu0 %v491_v61  ;;  %v919_v61 = vld [vmem:[#allocation20 + $0x18] sm:$0xff] }
  0xfb   :  { %559 = vmatprep.subr.mxu0 %v1977_v0 }
  0xfc   :  { %560 = vmatpush2.msra.mxu0 %v490_v62  ;;  %v734_v62 = vld [vmem:[#allocation19] sm:$0xff] }
  0xfd   :  { %685 = vmatprep.subr.mxu0 %v650_v63  ;;  %v918_v63 = vld [vmem:[#allocation20 + $0x10] sm:$0xff] }
 0x189   :  { %v353_v8 = vpop.f32.mrf.mxu0 }
 0x18a   :  { %v354_v11 = vadd.f32 %v353_v8, %v278_v7  ;;  %v917_v7 = vld [vmem:[#allocation20 + $0x8] sm:$0xff]  ;;  %v752_v8 = vld [vmem:[#allocation19 + $0x90] sm:$0xff] }
 0x18b   :  { %v355_v9 = vpop.f32.mrf.mxu0 }
 0x18c   :  { %v356_v10 = vadd.f32 %v355_v9, %v282_v6  ;;  %v753_v6 = vld [vmem:[#allocation19 + $0x98] sm:$0xff]  ;;  %v916_v9 = vld [vmem:[#allocation20] sm:$0xff] }
 0x18e   :  { %1401 = vmatprep.mubr.msk.f32.mxu1 %vm283_vm0, %v356_v10  ;;  %v751_v10 = vld [vmem:[#allocation19 + $0x88] sm:$0xff] }
 0x18f   :  { %635 = vmatmul.mubr.f32.vlgmr.msra.gmra.mxu1 %v354_v11  ;;  %v935_v11 = vld [vmem:[#allocation20 + $0x98] sm:$0xff] }
 0x190   :  { %758 = vmatpush1.msra.mxu1 %v749_v12  ;;  %v750_v12 = vld [vmem:[#allocation19 + $0x80] sm:$0xff] }
 0x191   :  { %759 = vmatprep.subr.mxu1 %v1977_v0 }
 0x192   :  { %760 = vmatpush1.msra.mxu1 %v748_v13  ;;  %v934_v13 = vld [vmem:[#allocation20 + $0x90] sm:$0xff] }
 0x193   :  { %761 = vmatprep.subr.mxu1 %v1977_v0 }
 0x194   :  { %762 = vmatpush1.msra.mxu1 %v747_v15  ;;  %v933_v15 = vld [vmem:[#allocation20 + $0x88] sm:$0xff] }
 0x195   :  { %v469_v19 = vpop.f32.mrf.mxu0  ;;  %763 = vmatprep.subr.mxu1 %v1977_v0 }
 0x196   :  { %764 = vmatpush1.msra.mxu1 %v746_v16  ;;  %v470_v24 = vadd.f32 %v469_v19, %v394_v18  ;;  %v932_v16 = vld [vmem:[#allocation20 + $0x80] sm:$0xff] }
 0x197   :  { %v471_v21 = vpop.f32.mrf.mxu0  ;;  %765 = vmatprep.subr.mxu1 %v1977_v0 }
 0x198   :  { %v472_v23 = vadd.f32 %v471_v21, %v398_v17  ;;  %766 = vmatpush1.msra.mxu1 %v745_v20 }
 0x199   :  { %767 = vmatprep.subr.mxu1 %v1977_v0 }
 0x19a   :  { %1400 = vmatprep.mubr.msk.f32.mxu0 %vm283_vm0, %v472_v23  ;;  %768 = vmatpush1.msra.mxu1 %v744_v22  ;;  %v2262_v22 = vsub.s32 2, %v2194_v2 }
 0x19b   :  { %562 = vmatmul.mubr.f32.vlgmr.msra.gmra.mxu0 %v470_v24  ;;  %769 = vmatprep.subr.mxu1 %v1977_v0 }
 0x19c   :  { %686 = vmatpush1.msra.mxu0 %v649_v25  ;;  %727 = vmatprep.mubr.f32.mxu0 %v1977_v0  ;;  %v658_v23 = vrot.slane %v2199_v4, %v2262_v22  ;;  %v654_v24 = vrot.slane %v2201_v5, %v2262_v22 }
 0x19d   :  { %687 = vmatprep.subr.mxu0 %v648_v26  ;;  %770 = vmatpush1.msra.mxu1 %v743_v44  ;;  %v2269_v26 = vsub.s32 3, %v2194_v2  ;;  %v1021_v44 = vld [vmem:[#allocation22 + $0x30] sm:$0xff] }
 0x19e   :  { %688 = vmatpush1.msra.mxu0 %v647_v27  ;;  %771 = vmatprep.subr.mxu1 %v1977_v0 }
 0x19f   :  { %689 = vmatprep.subr.mxu0 %v646_v28  ;;  %772 = vmatpush1.msra.mxu1 %v742_v46  ;;  %v1019_v46 = vld [vmem:[#allocation22 + $0x20] sm:$0xff] }
 0x1a0   :  { %690 = vmatpush1.msra.mxu0 %v645_v29  ;;  %773 = vmatprep.subr.mxu1 %v1977_v0  ;;  %v840_v29 = vrot.slane %v2199_v4, %v2269_v26  ;;  %v1027_v4 = vld [vmem:[#allocation22 + $0x60] sm:$0xff] }
 0x1a1   :  { %691 = vmatprep.subr.mxu0 %v644_v30  ;;  %774 = vmatpush1.msra.mxu1 %v741_v48  ;;  %v1017_v48 = vld [vmem:[#allocation22 + $0x10] sm:$0xff] }
 0x1a2   :  { %692 = vmatpush1.msra.mxu0 %v643_v31  ;;  %775 = vmatprep.subr.mxu1 %v1977_v0  ;;  %v836_v31 = vrot.slane %v2201_v5, %v2269_v26 }
 0x1a3   :  { %693 = vmatprep.subr.mxu0 %v642_v32  ;;  %776 = vmatpush1.msra.mxu1 %v740_v50  ;;  %v1015_v50 = vld [vmem:[#allocation22] sm:$0xff] }
 0x1a4   :  { %694 = vmatpush1.msra.mxu0 %v641_v33  ;;  %777 = vmatprep.subr.mxu1 %v1977_v0  ;;  %v1030_v33 = vld [vmem:[#allocation22 + $0x78] sm:$0xff] }
 0x1a5   :  { %1402 = vmatmul.mubr.msk.f32.vlgmr.msra.gmra.mxu0 %vm659_vm2, %v640_v34  ;;  %873 = vmatprep.subr.mxu0 %v832_v35  ;;  %v1029_v35 = vld [vmem:[#allocation22 + $0x70] sm:$0xff] }
 0x1a6   :  { %874 = vmatpush1.msra.mxu0 %v831_v36  ;;  %909 = vmatprep.mubr.f32.mxu0 %v1977_v0 }
 0x1a7   :  { %875 = vmatprep.subr.mxu0 %v830_v37  ;;  %778 = vmatpush1.msra.mxu1 %v739_v52 }
 0x1a8   :  { %876 = vmatpush1.msra.mxu0 %v829_v38  ;;  %779 = vmatprep.subr.mxu1 %v1977_v0  ;;  %v1028_v38 = vld [vmem:[#allocation22 + $0x68] sm:$0xff] }
 0x1a9   :  { %1404 = vmatmul.mubr.msk.f32.vlgmr.msra.gmra.mxu0 %vm841_vm3, %v828_v39  ;;  %939 = vmatprep.subr.mxu0 %v1977_v0  ;;  %v1026_v39 = vld [vmem:[#allocation22 + $0x58] sm:$0xff] }
 0x1aa   :  { %940 = vmatpush1.msra.mxu0 %v931_v40  ;;  %780 = vmatpush1.msra.mxu1 %v738_v54  ;;  %v1025_v40 = vld [vmem:[#allocation22 + $0x50] sm:$0xff] }
 0x1ab   :  { %941 = vmatprep.subr.mxu0 %v1977_v0  ;;  %781 = vmatprep.subr.mxu1 %v1977_v0 }
 0x1ac   :  { %942 = vmatpush1.msra.mxu0 %v930_v41  ;;  %782 = vmatpush1.msra.mxu1 %v737_v56  ;;  %v1024_v41 = vld [vmem:[#allocation22 + $0x48] sm:$0xff] }
 0x1ad   :  { %943 = vmatprep.subr.mxu0 %v1977_v0  ;;  %783 = vmatprep.subr.mxu1 %v1977_v0 }
 0x1ae   :  { %944 = vmatpush1.msra.mxu0 %v929_v42  ;;  %784 = vmatpush1.msra.mxu1 %v736_v58  ;;  %v1023_v42 = vld [vmem:[#allocation22 + $0x40] sm:$0xff] }
 0x1af   :  { %945 = vmatprep.subr.mxu0 %v1977_v0  ;;  %785 = vmatprep.subr.mxu1 %v1977_v0 }
 0x1b0   :  { %946 = vmatpush1.msra.mxu0 %v928_v43  ;;  %786 = vmatpush1.msra.mxu1 %v735_v60  ;;  %v1022_v43 = vld [vmem:[#allocation22 + $0x38] sm:$0xff] }
 0x1b1   :  { %947 = vmatprep.subr.mxu0 %v1977_v0  ;;  %787 = vmatprep.subr.mxu1 %v1977_v0  ;;  %v1155_v60 = vld [vmem:[#allocation23 + $0x78] sm:$0xff] }
 0x1b2   :  { %948 = vmatpush1.msra.mxu0 %v927_v45  ;;  %788 = vmatpush1.msra.mxu1 %v734_v62  ;;  %v1020_v45 = vld [vmem:[#allocation22 + $0x28] sm:$0xff] }
 0x1b3   :  { %949 = vmatprep.subr.mxu0 %v1977_v0  ;;  %813 = vmatprep.subr.mxu1 %v1977_v0  ;;  %v1153_v62 = vld [vmem:[#allocation23 + $0x68] sm:$0xff] }
 0x1b4   :  { %950 = vmatpush1.msra.mxu0 %v926_v47  ;;  %814 = vmatpush2.msra.mxu1 %v753_v6  ;;  %v1018_v47 = vld [vmem:[#allocation22 + $0x18] sm:$0xff] }
 0x1b5   :  { %951 = vmatprep.subr.mxu0 %v1977_v0  ;;  %815 = vmatprep.subr.mxu1 %v1977_v0  ;;  %v1151_v6 = vld [vmem:[#allocation23 + $0x58] sm:$0xff] }
 0x1b6   :  { %952 = vmatpush1.msra.mxu0 %v925_v49  ;;  %816 = vmatpush2.msra.mxu1 %v752_v8  ;;  %v1016_v49 = vld [vmem:[#allocation22 + $0x8] sm:$0xff] }
 0x1b7   :  { %953 = vmatprep.subr.mxu0 %v1977_v0  ;;  %817 = vmatprep.subr.mxu1 %v1977_v0  ;;  %v1149_v8 = vld [vmem:[#allocation23 + $0x48] sm:$0xff] }
 0x1b8   :  { %954 = vmatpush1.msra.mxu0 %v924_v51  ;;  %818 = vmatpush2.msra.mxu1 %v751_v10  ;;  %v1012_v51 = vsub.s32 4, %v2194_v2  ;;  %v1147_v10 = vld [vmem:[#allocation23 + $0x38] sm:$0xff] }
 0x1b9   :  { %955 = vmatprep.subr.mxu0 %v1977_v0  ;;  %819 = vmatprep.subr.mxu1 %v1977_v0 }
 0x1ba   :  { %956 = vmatpush1.msra.mxu0 %v923_v53  ;;  %820 = vmatpush2.msra.mxu1 %v750_v12  ;;  %v1145_v12 = vld [vmem:[#allocation23 + $0x28] sm:$0xff] }
 0x1bb   :  { %957 = vmatprep.subr.mxu0 %v1977_v0  ;;  %1457 = vmatprep.subr.mxu1 %v1977_v0 }
 0x1bc   :  { %958 = vmatpush1.msra.mxu0 %v922_v55  ;;  %v1013_v55 = vrot.slane %v2201_v5, %v1012_v51 }
 0x1bd   :  { %959 = vmatprep.subr.mxu0 %v1977_v0 }
 0x1be   :  { %960 = vmatpush1.msra.mxu0 %v921_v57 }
 0x1bf   :  { %961 = vmatprep.subr.mxu0 %v1977_v0 }
 0x1c0   :  { %962 = vmatpush1.msra.mxu0 %v920_v59 }
 0x1c1   :  { %963 = vmatprep.subr.mxu0 %v1977_v0 }
 0x1c2   :  { %964 = vmatpush1.msra.mxu0 %v919_v61  ;;  %v1154_v61 = vld [vmem:[#allocation23 + $0x70] sm:$0xff] }
 0x1c3   :  { %965 = vmatprep.subr.mxu0 %v1977_v0 }
 0x1c4   :  { %966 = vmatpush1.msra.mxu0 %v918_v63  ;;  %v1152_v63 = vld [vmem:[#allocation23 + $0x60] sm:$0xff] }
 0x1c5   :  { %967 = vmatprep.subr.mxu0 %v1977_v0 }
 0x1c6   :  { %968 = vmatpush1.msra.mxu0 %v917_v7  ;;  %v1150_v7 = vld [vmem:[#allocation23 + $0x50] sm:$0xff] }
 0x1c7   :  { %969 = vmatprep.subr.mxu0 %v1977_v0 }
 0x1c8   :  { %970 = vmatpush1.msra.mxu0 %v916_v9  ;;  %v1148_v9 = vld [vmem:[#allocation23 + $0x40] sm:$0xff] }
 0x1c9   :  { %995 = vmatprep.subr.mxu0 %v1977_v0 }
 0x1ca   :  { %996 = vmatpush2.msra.mxu0 %v935_v11  ;;  %v1146_v11 = vld [vmem:[#allocation23 + $0x30] sm:$0xff] }
 0x1cb   :  { %997 = vmatprep.subr.mxu0 %v1977_v0 }
 0x1cc   :  { %998 = vmatpush2.msra.mxu0 %v934_v13  ;;  %v1144_v13 = vld [vmem:[#allocation23 + $0x20] sm:$0xff] }
 0x1cd   :  { %999 = vmatprep.subr.mxu0 %v1977_v0 }
 0x1ce   :  { %1000 = vmatpush2.msra.mxu0 %v933_v15  ;;  %v1143_v15 = vld [vmem:[#allocation23 + $0x18] sm:$0xff] }
 0x1cf   :  { %1001 = vmatprep.subr.mxu0 %v1977_v0 }
 0x1d0   :  { %1002 = vmatpush2.msra.mxu0 %v932_v16  ;;  %v1142_v16 = vld [vmem:[#allocation23 + $0x10] sm:$0xff] }
 0x1d1   :  { %1492 = vmatprep.subr.mxu0 %v1977_v0 }
 0x24f   :  { %v636_v17 = vpop.f32.mrf.mxu1 }
 0x251   :  { %v638_v18 = vpop.f32.mrf.mxu1 }
 0x252   :  { %v1140_v18 = vld [vmem:[#allocation23] sm:$0xff] }
 0x25b   :  { %v563_v19 = vpop.f32.mrf.mxu0 }
 0x25c   :  { %v2259_v20 = vadd.f32 %v636_v17, %v563_v19  ;;  %v1141_v17 = vld [vmem:[#allocation23 + $0x8] sm:$0xff]  ;;  %v1033_v19 = vsub.s32 5, %v2194_v2 }
 0x25d   :  { %v565_v21 = vpop.f32.mrf.mxu0 }
 0x265   :  { %v729_v25 = vpop.f32.mrf.mxu0 }
 0x266   :  { %v730_v30 = vadd.f32 %v729_v25, %v654_v24 }
 0x267   :  { %v731_v27 = vpop.f32.mrf.mxu0 }
 0x268   :  { %v732_v28 = vadd.f32 %v731_v27, %v658_v23 }
 0x269   :  { %v911_v32 = vpop.f32.mrf.mxu0 }
 0x26a   :  { %1403 = vmatprep.mubr.msk.f32.mxu1 %vm283_vm0, %v732_v28  ;;  %v912_v37 = vadd.f32 %v911_v32, %v836_v31 }
 0x26b   :  { %822 = vmatmul.mubr.f32.vlgmr.msra.gmra.mxu1 %v730_v30  ;;  %v913_v34 = vpop.f32.mrf.mxu0 }
 0x26c   :  { %v914_v36 = vadd.f32 %v913_v34, %v840_v29  ;;  %1458 = vmatpush3.msra.mxu1 %v1030_v33  ;;  %1489 = vmatprep.mubr.msk.f32.mxu1 %vm1978_vm4, %v1977_v0 }
 0x26d   :  { %1459 = vmatprep.subr.mxu1 %v1977_v0 }
 0x26e   :  { %1405 = vmatprep.mubr.msk.f32.mxu0 %vm283_vm0, %v914_v36  ;;  %1460 = vmatpush3.msra.mxu1 %v1029_v35 }
 0x26f   :  { %1004 = vmatmul.mubr.f32.vlgmr.msra.gmra.mxu0 %v912_v37  ;;  %1461 = vmatprep.subr.mxu1 %v1977_v0 }
 0x270   :  { %1462 = vmatpush3.msra.mxu1 %v1028_v38  ;;  %1524 = vmatprep.mubr.msk.f32.mxu0 %vm1978_vm4, %v1977_v0 }
 0x271   :  { %1463 = vmatprep.subr.mxu1 %v1977_v0  ;;  %1493 = vmatpush3.msra.mxu0 %v1155_v60  ;;  %v1272_v60 = vld [vmem:[#allocation25 + $0x40] sm:$0xff] }
 0x272   :  { %1464 = vmatpush3.msra.mxu1 %v1027_v4  ;;  %1494 = vmatprep.subr.mxu0 %v1977_v0 }
 0x273   :  { %1465 = vmatprep.subr.mxu1 %v1977_v0  ;;  %1495 = vmatpush3.msra.mxu0 %v1154_v61  ;;  %v1271_v61 = vld [vmem:[#allocation25 + $0x38] sm:$0xff] }
 0x274   :  { %1466 = vmatpush3.msra.mxu1 %v1026_v39  ;;  %1496 = vmatprep.subr.mxu0 %v1977_v0 }
 0x275   :  { %1467 = vmatprep.subr.mxu1 %v1977_v0  ;;  %1497 = vmatpush3.msra.mxu0 %v1153_v62  ;;  %v1270_v62 = vld [vmem:[#allocation25 + $0x30] sm:$0xff] }
 0x276   :  { %1468 = vmatpush3.msra.mxu1 %v1025_v40  ;;  %1498 = vmatprep.subr.mxu0 %v1977_v0 }
 0x277   :  { %1469 = vmatprep.subr.mxu1 %v1977_v0  ;;  %1499 = vmatpush3.msra.mxu0 %v1152_v63  ;;  %v1269_v63 = vld [vmem:[#allocation25 + $0x28] sm:$0xff] }
 0x278   :  { %1470 = vmatpush3.msra.mxu1 %v1024_v41  ;;  %1500 = vmatprep.subr.mxu0 %v1977_v0 }
 0x279   :  { %1471 = vmatprep.subr.mxu1 %v1977_v0  ;;  %1501 = vmatpush3.msra.mxu0 %v1151_v6  ;;  %v1268_v6 = vld [vmem:[#allocation25 + $0x20] sm:$0xff] }
 0x27a   :  { %1472 = vmatpush3.msra.mxu1 %v1023_v42  ;;  %1502 = vmatprep.subr.mxu0 %v1977_v0  ;;  %v1127_v42 = vsub.s32 6, %v2194_v2 }
 0x27b   :  { %1473 = vmatprep.subr.mxu1 %v1977_v0  ;;  %1503 = vmatpush3.msra.mxu0 %v1150_v7  ;;  %v1267_v7 = vld [vmem:[#allocation25 + $0x18] sm:$0xff] }
 0x27c   :  { %1474 = vmatpush3.msra.mxu1 %v1022_v43  ;;  %1504 = vmatprep.subr.mxu0 %v1977_v0  ;;  %v1132_v43 = vsub.s32 7, %v2194_v2  ;;  %v1278_v2 = vld [vmem:[#allocation25 + $0x70] sm:$0xff] }
 0x27d   :  { %1475 = vmatprep.subr.mxu1 %v1977_v0  ;;  %1505 = vmatpush3.msra.mxu0 %v1149_v8  ;;  %v1266_v8 = vld [vmem:[#allocation25 + $0x10] sm:$0xff] }
 0x27e   :  { %1476 = vmatpush3.msra.mxu1 %v1021_v44  ;;  %1506 = vmatprep.subr.mxu0 %v1977_v0  ;;  %v1128_v44 = vrot.slane %v2201_v5, %v1127_v42 }
 0x27f   :  { %1477 = vmatprep.subr.mxu1 %v1977_v0  ;;  %1507 = vmatpush3.msra.mxu0 %v1148_v9  ;;  %v1265_v9 = vld [vmem:[#allocation25 + $0x8] sm:$0xff] }
 0x280   :  { %1478 = vmatpush3.msra.mxu1 %v1020_v45  ;;  %1508 = vmatprep.subr.mxu0 %v1977_v0 }
 0x281   :  { %1479 = vmatprep.subr.mxu1 %v1977_v0  ;;  %1509 = vmatpush3.msra.mxu0 %v1147_v10  ;;  %v1264_v10 = vld [vmem:[#allocation25] sm:$0xff] }
 0x282   :  { %1480 = vmatpush3.msra.mxu1 %v1019_v46  ;;  %1510 = vmatprep.subr.mxu0 %v1977_v0 }
 0x283   :  { %1481 = vmatprep.subr.mxu1 %v1977_v0  ;;  %1511 = vmatpush3.msra.mxu0 %v1146_v11  ;;  %v265_v11 = vld [vmem:[#allocation26 + $0x10] sm:$0xf] }
 0x284   :  { %1482 = vmatpush3.msra.mxu1 %v1018_v47  ;;  %1512 = vmatprep.subr.mxu0 %v1977_v0  ;;  %v1133_v47 = vrot.slane %v2201_v5, %v1132_v43 }
 0x285   :  { %1483 = vmatprep.subr.mxu1 %v1977_v0  ;;  %1513 = vmatpush3.msra.mxu0 %v1145_v12  ;;  %v1159_v12 = vrot.slane %v265_v11, %v2197_v3 }
 0x286   :  { %1484 = vmatpush3.msra.mxu1 %v1017_v48  ;;  %1514 = vmatprep.subr.mxu0 %v1977_v0 }
 0x287   :  { %1485 = vmatprep.subr.mxu1 %v1977_v0  ;;  %1515 = vmatpush3.msra.mxu0 %v1144_v13 }
 0x288   :  { %1486 = vmatpush3.msra.mxu1 %v1016_v49  ;;  %1516 = vmatprep.subr.mxu0 %v1977_v0 }
 0x289   :  { %1487 = vmatprep.subr.mxu1 %v1977_v0  ;;  %1517 = vmatpush3.msra.mxu0 %v1143_v15 }
 0x28a   :  { %1488 = vmatpush3.msra.mxu1 %v1015_v50  ;;  %1518 = vmatprep.subr.mxu0 %v1977_v0 }
 0x28b   :  { %1527 = vmatprep.subr.mxu1 %v1977_v0  ;;  %1519 = vmatpush3.msra.mxu0 %v1142_v16 }
 0x28c   :  { %1520 = vmatprep.subr.mxu0 %v1977_v0 }
 0x28d   :  { %1521 = vmatpush3.msra.mxu0 %v1141_v17 }
 0x28e   :  { %1522 = vmatprep.subr.mxu0 %v1977_v0 }
 0x28f   :  { %1523 = vmatpush3.msra.mxu0 %v1140_v18 }
 0x32b   :  { %v823_v52 = vpop.f32.mrf.mxu1 }
 0x32c   :  { %v827_v54 = vadd.f32 %v823_v52, %v2259_v20  ;;  %v1034_v20 = vrot.slane %v2201_v5, %v1033_v19  ;;  %v1276_v5 = vld [vmem:[#allocation25 + $0x60] sm:$0xff] }
 0x32d   :  { %v825_v53 = vpop.f32.mrf.mxu1 }
 0x32f   :  { %v1005_v56 = vpop.f32.mrf.mxu0 }
 0x330   :  { %v1009_v57 = vadd.f32 %v1005_v56, %v827_v54  ;;  %v1277_v56 = vld [vmem:[#allocation25 + $0x68] sm:$0xff] }
 0x331   :  { %v1007_v58 = vpop.f32.mrf.mxu0 }
 0x332   :  { %v1014_v59 = vadd.f32 %v1013_v55, %v1009_v57  ;;  %v1279_v55 = vld [vmem:[#allocation25 + $0x78] sm:$0xff]  ;;  %v1274_v58 = vld [vmem:[#allocation25 + $0x50] sm:$0xff] }
 0x333   :  { %v1275_v57 = vld [vmem:[#allocation25 + $0x58] sm:$0xff] }
 0x334   :  { %1490 = vmatmul.mubr.f32.vlgmr.msra.gmra.mxu1 %v1014_v59  ;;  %v1273_v59 = vld [vmem:[#allocation25 + $0x48] sm:$0xff] }
 0x335   :  { %1559 = vmatprep.mubr.msk.f32.mxu1 %vm1978_vm4, %v1977_v0  ;;  %1528 = vmatpush3.msra.mxu1 %v1279_v55 }
 0x336   :  { %1529 = vmatprep.subr.mxu1 %v1977_v0 }
 0x337   :  { %1530 = vmatpush3.msra.mxu1 %v1278_v2 }
 0x338   :  { %1531 = vmatprep.subr.mxu1 %v1977_v0 }
 0x339   :  { %1532 = vmatpush3.msra.mxu1 %v1277_v56 }
 0x33a   :  { %1533 = vmatprep.subr.mxu1 %v1977_v0 }
 0x33b   :  { %1534 = vmatpush3.msra.mxu1 %v1276_v5 }
 0x33c   :  { %1535 = vmatprep.subr.mxu1 %v1977_v0 }
 0x33d   :  { %1536 = vmatpush3.msra.mxu1 %v1275_v57 }
 0x33e   :  { %1537 = vmatprep.subr.mxu1 %v1977_v0 }
 0x33f   :  { %1538 = vmatpush3.msra.mxu1 %v1274_v58 }
 0x340   :  { %1539 = vmatprep.subr.mxu1 %v1977_v0 }
 0x341   :  { %1540 = vmatpush3.msra.mxu1 %v1273_v59 }
 0x342   :  { %1541 = vmatprep.subr.mxu1 %v1977_v0 }
 0x343   :  { %1542 = vmatpush3.msra.mxu1 %v1272_v60 }
 0x344   :  { %1543 = vmatprep.subr.mxu1 %v1977_v0 }
 0x345   :  { %1544 = vmatpush3.msra.mxu1 %v1271_v61 }
 0x346   :  { %1545 = vmatprep.subr.mxu1 %v1977_v0 }
 0x347   :  { %1546 = vmatpush3.msra.mxu1 %v1270_v62 }
 0x348   :  { %1547 = vmatprep.subr.mxu1 %v1977_v0 }
 0x349   :  { %1548 = vmatpush3.msra.mxu1 %v1269_v63 }
 0x34a   :  { %1549 = vmatprep.subr.mxu1 %v1977_v0 }
 0x34b   :  { %1550 = vmatpush3.msra.mxu1 %v1268_v6 }
 0x34c   :  { %1551 = vmatprep.subr.mxu1 %v1977_v0 }
 0x34d   :  { %1552 = vmatpush3.msra.mxu1 %v1267_v7 }
 0x34e   :  { %1553 = vmatprep.subr.mxu1 %v1977_v0 }
 0x34f   :  { %1554 = vmatpush3.msra.mxu1 %v1266_v8 }
 0x350   :  { %1555 = vmatprep.subr.mxu1 %v1977_v0 }
 0x351   :  { %1556 = vmatpush3.msra.mxu1 %v1265_v9 }
 0x352   :  { %1557 = vmatprep.subr.mxu1 %v1977_v0 }
 0x353   :  { %1558 = vmatpush3.msra.mxu1 %v1264_v10 }
 0x3f4   :  { %v1101_v21 = vpop.f32.mrf.mxu1 }
 0x3f5   :  { %v1102_v23 = vadd.f32 %v1101_v21, %v1034_v20 }
 0x3f6   :  { %v1491_v24 = vpop.f32.mrf.mxu1 }
 0x3f7   :  { %v1105_v25 = vrot.slane %v1102_v23, 4 }
 0x3f9   :  { %v1106_v27 = vadd.f32 %v1105_v25, %v1102_v23 }
 0x3fb   :  { %v1107_v28 = vrot.slane %v1106_v27, 2 }
 0x3fd   :  { %v1108_v29 = vadd.f32 %v1107_v28, %v1106_v27 }
 0x3ff   :  { %v1109_v30 = vrot.slane %v1108_v29, 1 }
 0x401   :  { %v1110_v31 = vadd.f32 %v1109_v30, %v1108_v29 }
 0x403   :  { %v1112_v32 = vmul.f32 0.125, %v1110_v31 }
 0x405   :  { %v1113_v33 = vsub.f32 %v1102_v23, %v1112_v32 }
 0x407   :  { %v1114_v34 = vmul.f32 %v1113_v33, %v1113_v33 }
 0x409   :  { %v1115_v35 = vrot.slane %v1114_v34, 4 }
 0x40b   :  { %v1116_v36 = vadd.f32 %v1115_v35, %v1114_v34  ;;  %v1252_v34 = vrot.slane %v265_v11, %v2209_v14 }
 0x40d   :  { %v1117_v37 = vrot.slane %v1116_v36, 2 }
 0x40f   :  { %v1118_v38 = vadd.f32 %v1117_v37, %v1116_v36  ;;  %v1257_v37 = vrot.slane %v265_v11, %v2262_v22 }
 0x411   :  { %v1119_v4 = vrot.slane %v1118_v38, 1 }
 0x413   :  { %v1120_v39 = vadd.f32 %v1119_v4, %v1118_v38 }
 0x415   :  { %v1121_v40 = vmul.f32 0.125, %v1120_v39 }
 0x417   :  { %v1122_v41 = vadd.f32 0.001, %v1121_v40 }
 0x419   :  { %1585 = vrsqrt.f32 %v1122_v41 }
 0x426   :  { %v1586_v45 = vpop.eup %1585 }
 0x427   :  { %v1124_v46 = vmul.f32 %v1586_v45, %v1113_v33 }
 0x429   :  { %v1129_v48 = vmul.f32 %v1128_v44, %v1124_v46  ;;  %v1283_v44 = vrot.slane %v265_v11, %v2269_v26 }
 0x42b   :  { %v1134_v49 = vadd.f32 %v1133_v47, %v1129_v48 }
 0x42d   :  { %v1136_v50 = vmul.f32 0.70710677, %v1134_v49  ;;  %v1135_v52 = vmul.f32 0.5, %v1134_v49 }
 0x42f   :  { %1587 = verf.f32 %v1136_v50 }
 0x43c   :  { %v1588_v51 = vpop.eup %1587 }
 0x43d   :  { %v1138_v53 = vadd.f32 1.0, %v1588_v51  ;;  %v1355_v51 = vand.u32 127, %v275_v1 }
 0x43f   :  { %v1139_v54 = vmul.f32 %v1138_v53, %v1135_v52  ;;  %vm1356_vm5 = vcmp.ge.s32.totalorder %v1355_v51, 32  ;;  %vm1357_vm6 = vcmp.lt.s32.totalorder %v1355_v51, 64 }
 0x440   :  { %vm1358_vm7 = vmand %vm1356_vm5, %vm1357_vm6 }
 0x441   :  { %1525 = vmatmul.mubr.f32.vlgmr.msra.gmra.mxu0 %v1139_v54 }
 0x501   :  { %v1226_v13 = vpop.f32.mrf.mxu0 }
 0x502   :  { %v1227_v15 = vadd.f32 %v1226_v13, %v1159_v12 }
 0x503   :  { %v1526_v16 = vpop.f32.mrf.mxu0 }
 0x504   :  { %v1230_v17 = vrot.slane %v1227_v15, 4 }
 0x506   :  { %v1231_v18 = vadd.f32 %v1230_v17, %v1227_v15 }
 0x508   :  { %v1232_v19 = vrot.slane %v1231_v18, 2 }
 0x50a   :  { %v1233_v20 = vadd.f32 %v1232_v19, %v1231_v18 }
 0x50c   :  { %v1234_v21 = vrot.slane %v1233_v20, 1 }
 0x50e   :  { %v1235_v23 = vadd.f32 %v1234_v21, %v1233_v20 }
 0x510   :  { %v1236_v24 = vmul.f32 0.125, %v1235_v23 }
 0x512   :  { %v1237_v25 = vsub.f32 %v1227_v15, %v1236_v24 }
 0x514   :  { %v1238_v27 = vmul.f32 %v1237_v25, %v1237_v25 }
 0x516   :  { %v1239_v28 = vrot.slane %v1238_v27, 4 }
 0x518   :  { %v1240_v29 = vadd.f32 %v1239_v28, %v1238_v27 }
 0x51a   :  { %v1241_v30 = vrot.slane %v1240_v29, 2 }
 0x51c   :  { %v1242_v0 = vadd.f32 %v1241_v30, %v1240_v29 }
 0x51e   :  { %v1243_v31 = vrot.slane %v1242_v0, 1 }
 0x520   :  { %v1244_v32 = vadd.f32 %v1243_v31, %v1242_v0 }
 0x522   :  { %v1245_v33 = vmul.f32 0.125, %v1244_v32 }
 0x524   :  { %v1246_v3 = vadd.f32 0.001, %v1245_v33 }
 0x526   :  { %1589 = vrsqrt.f32 %v1246_v3 }
 0x533   :  { %v1590_v35 = vpop.eup %1589 }
 0x534   :  { %v1248_v36 = vmul.f32 %v1590_v35, %v1237_v25 }
 0x536   :  { %v1253_v38 = vmul.f32 %v1252_v34, %v1248_v36 }
 0x538   :  { %v1258_v4 = vadd.f32 %v1257_v37, %v1253_v38 }
 0x53a   :  { %v1260_v39 = vmul.f32 0.70710677, %v1258_v4  ;;  %v1259_v41 = vmul.f32 0.5, %v1258_v4 }
 0x53c   :  { %1591 = verf.f32 %v1260_v39 }
 0x549   :  { %v1592_v40 = vpop.eup %1591 }
 0x54a   :  { %v1262_v42 = vadd.f32 1.0, %v1592_v40 }
 0x54c   :  { %v1263_v43 = vmul.f32 %v1262_v42, %v1259_v41 }
 0x54e   :  { %1560 = vmatmul.mubr.f32.vlgmr.msra.gmra.mxu1 %v1263_v43 }
 0x60e   :  { %v1350_v45 = vpop.f32.mrf.mxu1 }
 0x60f   :  { %v1351_v46 = vadd.f32 %v1350_v45, %v1283_v44 }
 0x610   :  { %v1561_v47 = vpop.f32.mrf.mxu1 }
 0x611   :  { %v1360_v48 = vmin.f32 %v1351_v46, 20.0  ;;  %vm1359_vm9 = vcmp.gt.f32.partialorder %v1351_v46, 20.0 }
 0x613   :  { %v1361_v14 = vmul.f32 1.442695, %v1360_v48 }
 0x615   :  { %1593 = vpow2.f32 %v1361_v14 }
 0x622   :  { %v1594_v49 = vpop.eup %1593 }
 0x623   :  { %v1363_v50 = vadd.f32 1.0, %v1594_v49  ;;  %v1366_v22 = vmul.f32 -0.5, %v1594_v49  ;;  %v1369_v53 = vand.u32 2147483647, %v1594_v49 }
 0x625   :  { %1595 = vlog2.f32 %v1363_v50  ;;  %v1367_v52 = vadd.f32 1.0, %v1366_v22  ;;  %vm1370_vm8 = vcmp.lt.f32.partialorder %v1369_v53, 0.0004427343 }
 0x627   :  { %v1368_v2 = vmul.f32 %v1594_v49, %v1367_v52 }
 0x632   :  { %v1596_v54 = vpop.eup %1595 }
 0x633   :  { %v1365_v55 = vmul.f32 0.6931472, %v1596_v54 }
 0x635   :  { %v1371_v26 = vsel %vm1370_vm8, %v1368_v2, %v1365_v55 }
 0x636   :  { %v1372_v56 = vsel %vm1359_vm9, %v1351_v46, %v1371_v26 }
 0x637   :  { %v1373_v5 = vsel %vm1358_vm7, %v1372_v56, %v1351_v46 }
 0x638   :  { %1374 = vst [vmem:[#allocation28] sm:$0xff] %v1373_v5 }
 0x639   :  { %1928 = shalt.err (!%p1925_p0)
}
 0x63a   :  { %1384 = dma.vmem_to_hbm [thread:$0]  %s1382_s15, 128, %s2359_s16, [#allocation4]  }
 0x63b   :  { %1955 = dma.done.wait [#allocation4], 128  }
 0x63c   :  { %1956 = vsyncadd [#allocation4], 4294967168 }
 0x63d   :  { %1388 = vsyncpa [#allocation3], 1 }
 0x63e   :  { %1389 = vsyncpa [#allocation6], 1 }
 0x63f   :  { %1390 = vsyncpa [#allocation9], 1 }
 0x640   :  { %1391 = vsyncpa [#allocation12], 1 }
 0x641   :  { %1392 = vsyncpa [#allocation15], 1 }
 0x642   :  { %1393 = vsyncpa [#allocation18], 1 }
 0x643   :  { %1394 = vsyncpa [#allocation21], 1 }
 0x644   :  { %1395 = vsyncpa [#allocation24], 1 }
 0x645   :  { %1396 = vsyncpa [#allocation27], 1 }
 0x646   :  { %1397 = vsyncpa [#allocation4], 1 }

</bundles_post_ra>
